<compile_context>
chip_gen: v6e
topology: v6e:2x2x1
jax: 0.10.0
libtpu: 0.0.40
codegen_flags: <defaults>
</compile_context>

<pallas_src>
import jax
import jax.numpy as jnp
from jax.experimental import pallas as pl
from jax.experimental.pallas import tpu as pltpu


# ----------------------------------------------------------------------------
# Kernel 1: both DialogueRNN directions.  grid = (direction=2, time=S).
# ----------------------------------------------------------------------------
def dialogue_rnn_kernel(
    u_ref, qmask_ref,
    g_wih_ref, g_whh_ref, g_bih_ref, g_bhh_ref,
    p_wih_ref, p_whh_ref, p_bih_ref, p_bhh_ref,
    e_wih_ref, e_whh_ref, e_bih_ref, e_bhh_ref,
    attw_ref,
    e_out_ref,
    g_hist_ref, g_prev_ref, q_ref, e_prev_ref,
):
    t = pl.program_id(1)
    S = g_hist_ref.shape[0]
    B, Dm = u_ref.shape[2], u_ref.shape[3]
    P = qmask_ref.shape[3]
    Dg = g_whh_ref.shape[1]
    Dp = p_whh_ref.shape[1]
    De = e_whh_ref.shape[1]

    @pl.when(t == 0)
    def _init():
        g_hist_ref[...] = jnp.zeros_like(g_hist_ref)
        g_prev_ref[...] = jnp.zeros_like(g_prev_ref)
        q_ref[...] = jnp.zeros_like(q_ref)
        e_prev_ref[...] = jnp.zeros_like(e_prev_ref)

    u = u_ref[0, 0]          # (B, Dm)
    qmask = qmask_ref[0, 0]  # (B, P)

    def gru(gx, h, whh_t, bhh, H):
        # gx = x @ W_ih^T + b_ih (precomputed); gate order [r, z, n]
        gh = jnp.dot(h, whh_t, preferred_element_type=jnp.float32) + bhh
        r = jax.nn.sigmoid(gx[:, :H] + gh[:, :H])
        z = jax.nn.sigmoid(gx[:, H:2 * H] + gh[:, H:2 * H])
        n = jnp.tanh(gx[:, 2 * H:] + r * gh[:, 2 * H:])
        return (1.0 - z) * n + z * h

    # --- speaker selection: one-hot of the first argmax over parties ---------
    p_iota = jax.lax.broadcasted_iota(jnp.int32, (B, P), 1)
    qmax = jnp.max(qmask, axis=1, keepdims=True)
    cand = jnp.where(qmask == qmax, p_iota, P)
    qm_idx = jnp.min(cand, axis=1, keepdims=True)          # (B, 1) first max
    onehot = (p_iota == qm_idx).astype(jnp.float32)        # (B, P)

    # --- previous party state of the current speaker -------------------------
    q0_sel = jnp.zeros((B, Dp), jnp.float32)
    for pp in range(P):                                    # P is tiny -> unroll
        q0_sel = q0_sel + onehot[:, pp:pp + 1] * q_ref[pp]

    # --- global GRU g_ -------------------------------------------------------
    g_wih = g_wih_ref[0]                                   # (Dm + Dp, 3*Dg)
    gx_g = (jnp.dot(u, g_wih[:Dm, :], preferred_element_type=jnp.float32)
            + jnp.dot(q0_sel, g_wih[Dm:, :], preferred_element_type=jnp.float32)
            + g_bih_ref[0])
    g_ = gru(gx_g, g_prev_ref[...], g_whh_ref[0], g_bhh_ref[0], Dg)

    # --- SimpleAttention over g_hist (rows < t) ------------------------------
    g_hist = g_hist_ref[...]                               # (S, B, Dg)
    w_att = attw_ref[0]                                    # (1, Dg)
    scale = jnp.sum(g_hist * w_att[None, :, :], axis=-1, keepdims=True)  # (S,B,1)
    row = jax.lax.broadcasted_iota(jnp.int32, (S, B, 1), 0)
    valid = row < t
    validf = valid.astype(jnp.float32)
    neg = jnp.where(valid, scale, -1e30)
    mmax = jnp.max(neg, axis=0, keepdims=True)
    pexp = jnp.exp(neg - mmax) * validf
    denom = jnp.sum(pexp, axis=0, keepdims=True)
    alpha = pexp / jnp.maximum(denom, 1e-30)               # all-zero when t == 0
    c_ = jnp.sum(alpha * g_hist, axis=0)                   # (B, Dg); zeros at t==0

    # --- party GRU (same input for every party; unrolled over P parties) -----
    p_wih = p_wih_ref[0]                                   # (Dm + Dg, 3*Dp)
    gx_p = (jnp.dot(u, p_wih[:Dm, :], preferred_element_type=jnp.float32)
            + jnp.dot(c_, p_wih[Dm:, :], preferred_element_type=jnp.float32)
            + p_bih_ref[0])                                # (B, 3*Dp)
    p_whh = p_whh_ref[0]
    p_bhh = p_bhh_ref[0]
    e_in = jnp.zeros((B, Dp), jnp.float32)
    for pp in range(P):
        q_p = q_ref[pp]                                    # old state ql_  (B, Dp)
        qs_p = gru(gx_p, q_p, p_whh, p_bhh, Dp)            # updated state qs_
        qm_p = qmask[:, pp:pp + 1]
        q_new_p = q_p * (1.0 - qm_p) + qs_p * qm_p
        q_ref[pp] = q_new_p
        e_in = e_in + onehot[:, pp:pp + 1] * q_new_p       # select_parties(q_, qm_idx)

    # --- emotion GRU ----------------------------------------------------------
    gx_e = (jnp.dot(e_in, e_wih_ref[0], preferred_element_type=jnp.float32)
            + e_bih_ref[0])
    e_ = gru(gx_e, e_prev_ref[...], e_whh_ref[0], e_bhh_ref[0], De)

    # --- state updates & output ----------------------------------------------
    g_hist_ref[t] = g_
    g_prev_ref[...] = g_
    e_prev_ref[...] = e_
    e_out_ref[0, 0] = e_


def dialogue_rnn_bidir(U_f, U_b, qmask_f, qmask_b, prm_f, prm_r):
    """Both directions in one pallas_call.

    U_*: (S, B, D_m), qmask_*: (S, B, P)  ->  (em_f, em_b) each (S, B, D_e).
    """
    S, B, Dm = U_f.shape
    P = qmask_f.shape[2]
    Dg = prm_f['g']['whh_t'].shape[0]
    Dp = prm_f['p']['whh_t'].shape[0]
    De = prm_f['e']['whh_t'].shape[0]

    U2 = jnp.stack([U_f, U_b])            # (2, S, B, Dm)
    Q2 = jnp.stack([qmask_f, qmask_b])    # (2, S, B, P)

    def stk(group, key):
        return jnp.stack([prm_f[group][key], prm_r[group][key]])

    weights = [
        stk('g', 'wih_t'), stk('g', 'whh_t'), stk('g', 'bih'), stk('g', 'bhh'),
        stk('p', 'wih_t'), stk('p', 'whh_t'), stk('p', 'bih'), stk('p', 'bhh'),
        stk('e', 'wih_t'), stk('e', 'whh_t'), stk('e', 'bih'), stk('e', 'bhh'),
        jnp.stack([prm_f['att_w'], prm_r['att_w']]),
    ]

    def _wspec(a):
        blk = (1,) + a.shape[1:]
        return pl.BlockSpec(blk, lambda d, t: (d, 0, 0))   # resident per-direction block

    grid_spec = pltpu.PrefetchScalarGridSpec(
        num_scalar_prefetch=0,
        grid=(2, S),
        in_specs=[
            pl.BlockSpec((1, 1, B, Dm), lambda d, t: (d, t, 0, 0)),
            pl.BlockSpec((1, 1, B, P), lambda d, t: (d, t, 0, 0)),
        ] + [_wspec(w) for w in weights],
        out_specs=pl.BlockSpec((1, 1, B, De), lambda d, t: (d, t, 0, 0)),
        scratch_shapes=[
            pltpu.VMEM((S, B, Dg), jnp.float32),   # g_hist
            pltpu.VMEM((B, Dg), jnp.float32),      # g_prev
            pltpu.VMEM((P, B, Dp), jnp.float32),   # party states (lane-aligned planes)
            pltpu.VMEM((B, De), jnp.float32),      # e_prev
        ],
    )
    out = pl.pallas_call(
        dialogue_rnn_kernel,
        out_shape=jax.ShapeDtypeStruct((2, S, B, De), jnp.float32),
        grid_spec=grid_spec,
        compiler_params=pltpu.CompilerParams(
            dimension_semantics=("parallel", "arbitrary")),
    )(U2, Q2, *weights)
    return out[0], out[1]


# ----------------------------------------------------------------------------
# Kernel 2: general2 matching attention + linear/ReLU + classifier + log_softmax
# ----------------------------------------------------------------------------
def matchatt_head_kernel(em_ref, mask_ref, wt_ref, bt_ref,
                         wl_ref, bl_ref, wf_ref, bf_ref, out_ref):
    t = pl.program_id(0)
    M = em_ref[...]                       # (S, B, 2*De)
    x = em_ref[t]                         # (B, 2*De) query at step t
    mask3 = mask_ref[...]                 # (S, B, 1)

    xt = jnp.dot(x, wt_ref[...], preferred_element_type=jnp.float32) + bt_ref[...]
    # alpha_ = tanh((x W + b) . (M * mask) * mask), softmax over seq, remask, renorm
    dots = jnp.sum(M * mask3 * xt[None, :, :], axis=-1, keepdims=True)   # (S,B,1)
    a = jnp.tanh(dots * mask3)
    amax = jnp.max(a, axis=0, keepdims=True)
    pe = jnp.exp(a - amax)
    alpha = pe / jnp.sum(pe, axis=0, keepdims=True)
    am = alpha * mask3
    am = am / jnp.maximum(jnp.sum(am, axis=0, keepdims=True), 1e-30)
    pool = jnp.sum(am * M, axis=0)                                       # (B, 2*De)

    hidden = jnp.maximum(
        jnp.dot(pool, wl_ref[...], preferred_element_type=jnp.float32) + bl_ref[...], 0.0)
    logits = jnp.dot(hidden, wf_ref[...], preferred_element_type=jnp.float32) + bf_ref[...]
    lmax = jnp.max(logits, axis=-1, keepdims=True)
    lse = lmax + jnp.log(jnp.sum(jnp.exp(logits - lmax), axis=-1, keepdims=True))
    out_ref[0] = logits - lse


def matchatt_head_forward(emotions, umask, att2, head):
    """emotions: (S, B, 2*De); umask: (B, S) -> log_prob (S, B, n_classes)."""
    S, B, D2 = emotions.shape
    C = head['w_fc'].shape[1]
    mask3 = jnp.transpose(umask)[:, :, None].astype(jnp.float32)  # (S, B, 1)

    ins = [emotions, mask3, att2['w_t'], att2['b'],
           head['w_lin'], head['b_lin'], head['w_fc'], head['b_fc']]
    in_specs = [
        pl.BlockSpec((S, B, D2), lambda t: (0, 0, 0)),
        pl.BlockSpec((S, B, 1), lambda t: (0, 0, 0)),
    ] + [pl.BlockSpec(a.shape, lambda t: (0, 0)) for a in ins[2:]]

    grid_spec = pltpu.PrefetchScalarGridSpec(
        num_scalar_prefetch=0,
        grid=(S,),
        in_specs=in_specs,
        out_specs=pl.BlockSpec((1, B, C), lambda t: (t, 0, 0)),
    )
    return pl.pallas_call(
        matchatt_head_kernel,
        out_shape=jax.ShapeDtypeStruct((S, B, C), jnp.float32),
        grid_spec=grid_spec,
        compiler_params=pltpu.CompilerParams(dimension_semantics=("parallel",)),
    )(*ins)


# ----------------------------------------------------------------------------
# JAX-side plumbing (no clean Pallas equivalent for the length-dependent flip)
# ----------------------------------------------------------------------------
def reverse_seq(X, mask):
    """X: (S, B, D); mask: (B, S). Per-batch flip of the first len_b steps."""
    # TODO(synk): _reverse_seq / pad_sequence is a data-dependent gather; done in JAX.
    S, B = X.shape[0], X.shape[1]
    lens = jnp.sum(mask, axis=1).astype(jnp.int32)
    t_idx = jnp.arange(S)[:, None]
    src = lens[None, :] - 1 - t_idx
    valid = src >= 0
    src_c = jnp.clip(src, 0, S - 1)
    b_idx = jnp.broadcast_to(jnp.arange(B)[None, :], (S, B))
    out = X[src_c, b_idx]
    return jnp.where(valid[:, :, None], out, 0.0)


def dialog_rnn_model_forward(U, qmask, umask, params):
    # TODO(synk): dropout / dropout_rec are identity (eval-mode forward).
    # TODO(synk): attention weights (alpha, alpha_f, alpha_b) are not returned.
    rev_U = reverse_seq(U, umask)
    rev_qmask = reverse_seq(qmask, umask)
    em_f, em_b_rev = dialogue_rnn_bidir(
        U, rev_U, qmask, rev_qmask, params['rnn_f'], params['rnn_r'])
    em_b = reverse_seq(em_b_rev, umask)
    emotions = jnp.concatenate([em_f, em_b], axis=-1)
    log_prob = matchatt_head_forward(emotions, umask, params['att2'], params['head'])
    return log_prob, emotions


# ----------------------------------------------------------------------------
# Parameters
# ----------------------------------------------------------------------------
def init_params(key, Dm, Dg, Dp, De, Dh, C, scale=0.1):
    def lin(k, i, o):
        k1, k2 = jax.random.split(k)
        return {'w_t': scale * jax.random.normal(k1, (i, o), jnp.float32),
                'b': scale * jax.random.normal(k2, (1, o), jnp.float32)}

    def gru(k, i, h):
        k1, k2, k3, k4 = jax.random.split(k, 4)
        return {'wih_t': scale * jax.random.normal(k1, (i, 3 * h), jnp.float32),
                'whh_t': scale * jax.random.normal(k2, (h, 3 * h), jnp.float32),
                'bih': scale * jax.random.normal(k3, (1, 3 * h), jnp.float32),
                'bhh': scale * jax.random.normal(k4, (1, 3 * h), jnp.float32)}

    def rnn(k):
        k1, k2, k3, k4 = jax.random.split(k, 4)
        return {'g': gru(k1, Dm + Dp, Dg), 'p': gru(k2, Dm + Dg, Dp),
                'e': gru(k3, Dp, De),
                'att_w': scale * jax.random.normal(k4, (1, Dg), jnp.float32)}

    ks = jax.random.split(key, 5)
    lin1 = lin(ks[2], 2 * De, Dh)
    fc = lin(ks[3], Dh, C)
    return {'rnn_f': rnn(ks[0]), 'rnn_r': rnn(ks[1]),
            'att2': lin(ks[4], 2 * De, 2 * De),
            'head': {'w_lin': lin1['w_t'], 'b_lin': lin1['b'],
                     'w_fc': fc['w_t'], 'b_fc': fc['b']}}


# ----------------------------------------------------------------------------
# Pure-JAX reference (mirrors the PyTorch forward, eval mode)
# ----------------------------------------------------------------------------
def _gru_ref(x, h, p):
    H = h.shape[-1]
    gx = x @ p['wih_t'] + p['bih']
    gh = h @ p['whh_t'] + p['bhh']
    r = jax.nn.sigmoid(gx[:, :H] + gh[:, :H])
    z = jax.nn.sigmoid(gx[:, H:2 * H] + gh[:, H:2 * H])
    n = jnp.tanh(gx[:, 2 * H:] + r * gh[:, 2 * H:])
    return (1 - z) * n + z * h


def _dialogue_rnn_ref(U, qmask, prm):
    S, B, Dm = U.shape
    P = qmask.shape[2]
    Dg = prm['g']['whh_t'].shape[0]
    Dp = prm['p']['whh_t'].shape[0]
    De = prm['e']['whh_t'].shape[0]
    g_hist, es = [], []
    q = jnp.zeros((B, P, Dp), jnp.float32)
    e_prev = jnp.zeros((B, De), jnp.float32)
    for t in range(S):
        u_t, qm = U[t], qmask[t]
        idx = jnp.argmax(qm, axis=1)
        onehot = jax.nn.one_hot(idx, P, dtype=jnp.float32)
        q0_sel = jnp.einsum('bp,bpd->bd', onehot, q)
        g_prev = g_hist[-1] if g_hist else jnp.zeros((B, Dg), jnp.float32)
        g_ = _gru_ref(jnp.concatenate([u_t, q0_sel], 1), g_prev, prm['g'])
        if t == 0:
            c_ = jnp.zeros((B, Dg), jnp.float32)
        else:
            Gh = jnp.stack(g_hist, 0)
            scale = jnp.einsum('sbd,d->sb', Gh, prm['att_w'][0])
            alpha = jax.nn.softmax(scale, axis=0)
            c_ = jnp.einsum('sb,sbd->bd', alpha, Gh)
        xp = jnp.concatenate([u_t, c_], 1)
        xp_full = jnp.broadcast_to(xp[:, None, :], (B, P, xp.shape[1])).reshape(B * P, -1)
        qs = _gru_ref(xp_full, q.reshape(B * P, Dp), prm['p']).reshape(B, P, Dp)
        qm3 = qm[:, :, None]
        q = q * (1 - qm3) + qs * qm3
        e_in = jnp.einsum('bp,bpd->bd', onehot, q)
        e_ = _gru_ref(e_in, e_prev, prm['e'])
        e_prev = e_
        g_hist.append(g_)
        es.append(e_)
    return jnp.stack(es, 0)


def model_forward_ref(U, qmask, umask, params):
    em_f = _dialogue_rnn_ref(U, qmask, params['rnn_f'])
    rev_U = reverse_seq(U, umask)
    rev_qmask = reverse_seq(qmask, umask)
    em_b = _dialogue_rnn_ref(rev_U, rev_qmask, params['rnn_r'])
    em_b = reverse_seq(em_b, umask)
    emotions = jnp.concatenate([em_f, em_b], -1)
    S = emotions.shape[0]
    maskT = umask.T
    outs = []
    for t in range(S):
        x = emotions[t]
        xt = x @ params['att2']['w_t'] + params['att2']['b']
        Mm = emotions * maskT[:, :, None]
        logits = jnp.einsum('bd,sbd->bs', xt, Mm) * umask
        a = jnp.tanh(logits)
        alpha = jax.nn.softmax(a, axis=1)
        am = alpha * umask
        am = am / jnp.sum(am, axis=1, keepdims=True)
        outs.append(jnp.einsum('bs,sbd->bd', am, emotions))
    att = jnp.stack(outs, 0)
    hidden = jax.nn.relu(att @ params['head']['w_lin'] + params['head']['b_lin'])
    logits_c = hidden @ params['head']['w_fc'] + params['head']['b_fc']
    return jax.nn.log_softmax(logits_c, axis=-1), emotions


# ----------------------------------------------------------------------------
if __name__ == "__main__":
    S, B, P = 8, 2, 2
    Dm = Dg = Dp = De = Dh = 32
    C = 7

    key = jax.random.PRNGKey(0)
    kU, kq, kp = jax.random.split(key, 3)
    U = jax.random.normal(kU, (S, B, Dm), jnp.float32)
    spk = jax.random.randint(kq, (S, B), 0, P)
    # utterance mask: batch 0 full length, batch 1 length 6
    lens = jnp.array([S, 6], jnp.int32)
    umask = (jnp.arange(S)[None, :] < lens[:, None]).astype(jnp.float32)      # (B, S)
    qmask = jax.nn.one_hot(spk, P, dtype=jnp.float32) * umask.T[:, :, None]   # (S, B, P)

    params = init_params(kp, Dm, Dg, Dp, De, Dh, C)

    fwd = jax.jit(dialog_rnn_model_forward)
    log_prob, emotions = fwd(U, qmask, umask, params)
    jax.block_until_ready((log_prob, emotions))

    ref_lp, ref_em = jax.jit(model_forward_ref)(U, qmask, umask, params)
    jax.block_until_ready((ref_lp, ref_em))
    err_lp = float(jnp.max(jnp.abs(log_prob - ref_lp)))
    err_em = float(jnp.max(jnp.abs(emotions - ref_em)))
    if not (err_lp < 5e-2 and err_em < 5e-2):
        raise AssertionError(
            f"mismatch vs reference: log_prob err={err_lp:.3e}, emotions err={err_em:.3e}")

    print("KERNEL_OK")
</pallas_src>

<mosaic_0001>
module attributes {stable_mosaic.version = 11 : i64} {
  func.func @matchatt_head_kernel(%arg0: i32, %arg1: memref<8x2x64xf32, #tpu.memory_space<vmem>>, %arg2: memref<8x2x1xf32, #tpu.memory_space<vmem>>, %arg3: memref<64x64xf32, #tpu.memory_space<vmem>>, %arg4: memref<1x64xf32, #tpu.memory_space<vmem>>, %arg5: memref<64x32xf32, #tpu.memory_space<vmem>>, %arg6: memref<1x32xf32, #tpu.memory_space<vmem>>, %arg7: memref<32x7xf32, #tpu.memory_space<vmem>>, %arg8: memref<1x7xf32, #tpu.memory_space<vmem>>, %arg9: memref<1x2x7xf32, #tpu.memory_space<vmem>>) attributes {dimension_semantics = [#tpu.dimension_semantics<parallel>], iteration_bounds = array<i64: 8>, scalar_prefetch = 0 : i64, scratch_operands = 0 : i64, tpu.core_type = #tpu.core_type<tc>, window_params = [{pipeline_mode = #tpu.pipeline_mode<synchronous>, transform_indices = @transform_0, window_bounds = array<i64: 8, 2, 64>}, {pipeline_mode = #tpu.pipeline_mode<synchronous>, transform_indices = @transform_1, window_bounds = array<i64: 8, 2, 1>}, {pipeline_mode = #tpu.pipeline_mode<synchronous>, transform_indices = @transform_2, window_bounds = array<i64: 64, 64>}, {pipeline_mode = #tpu.pipeline_mode<synchronous>, transform_indices = @transform_3, window_bounds = array<i64: 1, 64>}, {pipeline_mode = #tpu.pipeline_mode<synchronous>, transform_indices = @transform_4, window_bounds = array<i64: 64, 32>}, {pipeline_mode = #tpu.pipeline_mode<synchronous>, transform_indices = @transform_5, window_bounds = array<i64: 1, 32>}, {pipeline_mode = #tpu.pipeline_mode<synchronous>, transform_indices = @transform_6, window_bounds = array<i64: 32, 7>}, {pipeline_mode = #tpu.pipeline_mode<synchronous>, transform_indices = @transform_7, window_bounds = array<i64: 1, 7>}, {transform_indices = @transform_8, window_bounds = array<i64: 1, 2, 7>}]} {
    %c0 = arith.constant 0 : index
    %c0_0 = arith.constant 0 : index
    %c0_1 = arith.constant 0 : index
    %0 = vector.load %arg1[%c0, %c0_0, %c0_1] : memref<8x2x64xf32, #tpu.memory_space<vmem>>, vector<8x2x64xf32>
    %1 = arith.index_cast %arg0 : i32 to index
    %c0_2 = arith.constant 0 : index
    %c0_3 = arith.constant 0 : index
    %2 = vector.load %arg1[%1, %c0_2, %c0_3] : memref<8x2x64xf32, #tpu.memory_space<vmem>>, vector<1x2x64xf32>
    %3 = vector.shape_cast %2 : vector<1x2x64xf32> to vector<2x64xf32>
    %c0_4 = arith.constant 0 : index
    %c0_5 = arith.constant 0 : index
    %c0_6 = arith.constant 0 : index
    %4 = vector.load %arg2[%c0_4, %c0_5, %c0_6] : memref<8x2x1xf32, #tpu.memory_space<vmem>>, vector<8x2x1xf32>
    %c0_7 = arith.constant 0 : index
    %c0_8 = arith.constant 0 : index
    %5 = vector.load %arg3[%c0_7, %c0_8] : memref<64x64xf32, #tpu.memory_space<vmem>>, vector<64x64xf32>
    %cst = arith.constant dense<0.000000e+00> : vector<2x64xf32>
    %6 = tpu.matmul %3, %5, %cst {dimension_numbers = #tpu.dot_dimension_numbers<[1], [0], [0], [1], [0, 0, 1, 1], [], []>} : vector<2x64xf32>, vector<64x64xf32>, vector<2x64xf32> -> vector<2x64xf32>
    %c0_9 = arith.constant 0 : index
    %c0_10 = arith.constant 0 : index
    %7 = vector.load %arg4[%c0_9, %c0_10] : memref<1x64xf32, #tpu.memory_space<vmem>>, vector<1x64xf32>
    %8 = vector.broadcast %7 : vector<1x64xf32> to vector<2x64xf32>
    %9 = arith.addf %6, %8 : vector<2x64xf32>
    %10 = vector.broadcast %4 : vector<8x2x1xf32> to vector<8x2x64xf32>
    %11 = arith.mulf %0, %10 : vector<8x2x64xf32>
    %12 = vector.shape_cast %9 : vector<2x64xf32> to vector<1x2x64xf32>
    %13 = vector.broadcast %12 : vector<1x2x64xf32> to vector<8x2x64xf32>
    %14 = arith.mulf %11, %13 : vector<8x2x64xf32>
    %cst_11 = arith.constant dense<0.000000e+00> : vector<8x2xf32>
    %15 = vector.multi_reduction <add>, %14, %cst_11 [2] : vector<8x2x64xf32> to vector<8x2xf32>
    %16 = vector.shape_cast %15 : vector<8x2xf32> to vector<8x2x1xf32>
    %17 = arith.mulf %16, %4 : vector<8x2x1xf32>
    %18 = math.tanh %17 : vector<8x2x1xf32>
    %cst_12 = arith.constant dense<0xFF800000> : vector<2x1xf32>
    %19 = vector.multi_reduction <maximumf>, %18, %cst_12 [0] : vector<8x2x1xf32> to vector<2x1xf32>
    %20 = vector.shape_cast %19 : vector<2x1xf32> to vector<1x2x1xf32>
    %21 = vector.broadcast %20 : vector<1x2x1xf32> to vector<8x2x1xf32>
    %22 = arith.subf %18, %21 : vector<8x2x1xf32>
    %23 = math.exp %22 : vector<8x2x1xf32>
    %cst_13 = arith.constant dense<0.000000e+00> : vector<2x1xf32>
    %24 = vector.multi_reduction <add>, %23, %cst_13 [0] : vector<8x2x1xf32> to vector<2x1xf32>
    %25 = vector.shape_cast %24 : vector<2x1xf32> to vector<1x2x1xf32>
    %26 = vector.broadcast %25 : vector<1x2x1xf32> to vector<8x2x1xf32>
    %27 = arith.divf %23, %26 : vector<8x2x1xf32>
    %28 = arith.mulf %27, %4 : vector<8x2x1xf32>
    %cst_14 = arith.constant dense<0.000000e+00> : vector<2x1xf32>
    %29 = vector.multi_reduction <add>, %28, %cst_14 [0] : vector<8x2x1xf32> to vector<2x1xf32>
    %30 = vector.shape_cast %29 : vector<2x1xf32> to vector<1x2x1xf32>
    %cst_15 = arith.constant 1.000000e-30 : f32
    %31 = vector.broadcast %cst_15 : f32 to vector<1x2x1xf32>
    %32 = arith.maximumf %30, %31 : vector<1x2x1xf32>
    %33 = vector.broadcast %32 : vector<1x2x1xf32> to vector<8x2x1xf32>
    %34 = arith.divf %28, %33 : vector<8x2x1xf32>
    %35 = vector.broadcast %34 : vector<8x2x1xf32> to vector<8x2x64xf32>
    %36 = arith.mulf %35, %0 : vector<8x2x64xf32>
    %cst_16 = arith.constant dense<0.000000e+00> : vector<2x64xf32>
    %37 = vector.multi_reduction <add>, %36, %cst_16 [0] : vector<8x2x64xf32> to vector<2x64xf32>
    %c0_17 = arith.constant 0 : index
    %c0_18 = arith.constant 0 : index
    %38 = vector.load %arg5[%c0_17, %c0_18] : memref<64x32xf32, #tpu.memory_space<vmem>>, vector<64x32xf32>
    %cst_19 = arith.constant dense<0.000000e+00> : vector<2x32xf32>
    %39 = tpu.matmul %37, %38, %cst_19 {dimension_numbers = #tpu.dot_dimension_numbers<[1], [0], [0], [1], [0, 0, 1, 1], [], []>} : vector<2x64xf32>, vector<64x32xf32>, vector<2x32xf32> -> vector<2x32xf32>
    %c0_20 = arith.constant 0 : index
    %c0_21 = arith.constant 0 : index
    %40 = vector.load %arg6[%c0_20, %c0_21] : memref<1x32xf32, #tpu.memory_space<vmem>>, vector<1x32xf32>
    %41 = vector.broadcast %40 : vector<1x32xf32> to vector<2x32xf32>
    %42 = arith.addf %39, %41 : vector<2x32xf32>
    %cst_22 = arith.constant 0.000000e+00 : f32
    %43 = vector.broadcast %cst_22 : f32 to vector<2x32xf32>
    %44 = arith.maximumf %42, %43 : vector<2x32xf32>
    %c0_23 = arith.constant 0 : index
    %c0_24 = arith.constant 0 : index
    %45 = vector.load %arg7[%c0_23, %c0_24] : memref<32x7xf32, #tpu.memory_space<vmem>>, vector<32x7xf32>
    %cst_25 = arith.constant dense<0.000000e+00> : vector<2x7xf32>
    %46 = tpu.matmul %44, %45, %cst_25 {dimension_numbers = #tpu.dot_dimension_numbers<[1], [0], [0], [1], [0, 0, 1, 1], [], []>} : vector<2x32xf32>, vector<32x7xf32>, vector<2x7xf32> -> vector<2x7xf32>
    %c0_26 = arith.constant 0 : index
    %c0_27 = arith.constant 0 : index
    %47 = vector.load %arg8[%c0_26, %c0_27] : memref<1x7xf32, #tpu.memory_space<vmem>>, vector<1x7xf32>
    %48 = vector.broadcast %47 : vector<1x7xf32> to vector<2x7xf32>
    %49 = arith.addf %46, %48 : vector<2x7xf32>
    %cst_28 = arith.constant dense<0xFF800000> : vector<2xf32>
    %50 = vector.multi_reduction <maximumf>, %49, %cst_28 [1] : vector<2x7xf32> to vector<2xf32>
    %51 = vector.shape_cast %50 : vector<2xf32> to vector<2x1xf32>
    %52 = vector.broadcast %51 : vector<2x1xf32> to vector<2x7xf32>
    %53 = arith.subf %49, %52 : vector<2x7xf32>
    %54 = math.exp %53 : vector<2x7xf32>
    %cst_29 = arith.constant dense<0.000000e+00> : vector<2xf32>
    %55 = vector.multi_reduction <add>, %54, %cst_29 [1] : vector<2x7xf32> to vector<2xf32>
    %56 = vector.shape_cast %55 : vector<2xf32> to vector<2x1xf32>
    %57 = math.log %56 : vector<2x1xf32>
    %58 = arith.addf %51, %57 : vector<2x1xf32>
    %59 = vector.broadcast %58 : vector<2x1xf32> to vector<2x7xf32>
    %60 = arith.subf %49, %59 : vector<2x7xf32>
    %c0_30 = arith.constant 0 : index
    %c0_31 = arith.constant 0 : index
    %c0_32 = arith.constant 0 : index
    %61 = vector.load %arg9[%c0_30, %c0_31, %c0_32] : memref<1x2x7xf32, #tpu.memory_space<vmem>>, vector<1x2x7xf32>
    %62 = vector.shape_cast %61 : vector<1x2x7xf32> to vector<2x7xf32>
    %63 = vector.shape_cast %60 : vector<2x7xf32> to vector<1x2x7xf32>
    tpu.vector_store %arg9[%c0_30, %c0_31, %c0_32], %63 {strides = array<i32>} : memref<1x2x7xf32, #tpu.memory_space<vmem>>, vector<1x2x7xf32>,
    return
  }
  func.func @transform_0(%arg0: i32) -> (i32, i32, i32) {
    %c0_i32 = arith.constant 0 : i32
    %c0_i32_0 = arith.constant 0 : i32
    %c0_i32_1 = arith.constant 0 : i32
    %c0_i32_2 = arith.constant 0 : i32
    return %c0_i32, %c0_i32_0, %c0_i32_1 : i32, i32, i32
  }
  func.func @transform_1(%arg0: i32) -> (i32, i32, i32) {
    %c0_i32 = arith.constant 0 : i32
    %c0_i32_0 = arith.constant 0 : i32
    %c0_i32_1 = arith.constant 0 : i32
    %c0_i32_2 = arith.constant 0 : i32
    return %c0_i32, %c0_i32_0, %c0_i32_1 : i32, i32, i32
  }
  func.func @transform_2(%arg0: i32) -> (i32, i32) {
    %c0_i32 = arith.constant 0 : i32
    %c0_i32_0 = arith.constant 0 : i32
    %c0_i32_1 = arith.constant 0 : i32
    return %c0_i32, %c0_i32_0 : i32, i32
  }
  func.func @transform_3(%arg0: i32) -> (i32, i32) {
    %c0_i32 = arith.constant 0 : i32
    %c0_i32_0 = arith.constant 0 : i32
    %c0_i32_1 = arith.constant 0 : i32
    return %c0_i32, %c0_i32_0 : i32, i32
  }
  func.func @transform_4(%arg0: i32) -> (i32, i32) {
    %c0_i32 = arith.constant 0 : i32
    %c0_i32_0 = arith.constant 0 : i32
    %c0_i32_1 = arith.constant 0 : i32
    return %c0_i32, %c0_i32_0 : i32, i32
  }
  func.func @transform_5(%arg0: i32) -> (i32, i32) {
    %c0_i32 = arith.constant 0 : i32
    %c0_i32_0 = arith.constant 0 : i32
    %c0_i32_1 = arith.constant 0 : i32
    return %c0_i32, %c0_i32_0 : i32, i32
  }
  func.func @transform_6(%arg0: i32) -> (i32, i32) {
    %c0_i32 = arith.constant 0 : i32
    %c0_i32_0 = arith.constant 0 : i32
    %c0_i32_1 = arith.constant 0 : i32
    return %c0_i32, %c0_i32_0 : i32, i32
  }
  func.func @transform_7(%arg0: i32) -> (i32, i32) {
    %c0_i32 = arith.constant 0 : i32
    %c0_i32_0 = arith.constant 0 : i32
    %c0_i32_1 = arith.constant 0 : i32
    return %c0_i32, %c0_i32_0 : i32, i32
  }
  func.func @transform_8(%arg0: i32) -> (i32, i32, i32) {
    %c0_i32 = arith.constant 0 : i32
    %c0_i32_0 = arith.constant 0 : i32
    %c0_i32_1 = arith.constant 0 : i32
    return %arg0, %c0_i32, %c0_i32_0 : i32, i32, i32
  }
}

module attributes {stable_mosaic.version = 11 : i64} {
  func.func @dialogue_rnn_kernel(%arg0: i32, %arg1: i32, %arg2: memref<1x1x2x32xf32, #tpu.memory_space<vmem>>, %arg3: memref<1x1x2x2xf32, #tpu.memory_space<vmem>>, %arg4: memref<1x64x96xf32, #tpu.memory_space<vmem>>, %arg5: memref<1x32x96xf32, #tpu.memory_space<vmem>>, %arg6: memref<1x1x96xf32, #tpu.memory_space<vmem>>, %arg7: memref<1x1x96xf32, #tpu.memory_space<vmem>>, %arg8: memref<1x64x96xf32, #tpu.memory_space<vmem>>, %arg9: memref<1x32x96xf32, #tpu.memory_space<vmem>>, %arg10: memref<1x1x96xf32, #tpu.memory_space<vmem>>, %arg11: memref<1x1x96xf32, #tpu.memory_space<vmem>>, %arg12: memref<1x32x96xf32, #tpu.memory_space<vmem>>, %arg13: memref<1x32x96xf32, #tpu.memory_space<vmem>>, %arg14: memref<1x1x96xf32, #tpu.memory_space<vmem>>, %arg15: memref<1x1x96xf32, #tpu.memory_space<vmem>>, %arg16: memref<1x1x32xf32, #tpu.memory_space<vmem>>, %arg17: memref<1x1x2x32xf32, #tpu.memory_space<vmem>>, %arg18: memref<8x2x32xf32, #tpu.memory_space<vmem>>, %arg19: memref<2x32xf32, #tpu.memory_space<vmem>>, %arg20: memref<2x2x32xf32, #tpu.memory_space<vmem>>, %arg21: memref<2x32xf32, #tpu.memory_space<vmem>>) attributes {dimension_semantics = [#tpu.dimension_semantics<parallel>, #tpu.dimension_semantics<arbitrary>], iteration_bounds = array<i64: 2, 8>, scalar_prefetch = 0 : i64, scratch_operands = 4 : i64, tpu.core_type = #tpu.core_type<tc>, window_params = [{transform_indices = @transform_0, window_bounds = array<i64: 1, 1, 2, 32>}, {transform_indices = @transform_1, window_bounds = array<i64: 1, 1, 2, 2>}, {transform_indices = @transform_2, window_bounds = array<i64: 1, 64, 96>}, {transform_indices = @transform_3, window_bounds = array<i64: 1, 32, 96>}, {transform_indices = @transform_4, window_bounds = array<i64: 1, 1, 96>}, {transform_indices = @transform_5, window_bounds = array<i64: 1, 1, 96>}, {transform_indices = @transform_6, window_bounds = array<i64: 1, 64, 96>}, {transform_indices = @transform_7, window_bounds = array<i64: 1, 32, 96>}, {transform_indices = @transform_8, window_bounds = array<i64: 1, 1, 96>}, {transform_indices = @transform_9, window_bounds = array<i64: 1, 1, 96>}, {transform_indices = @transform_10, window_bounds = array<i64: 1, 32, 96>}, {transform_indices = @transform_11, window_bounds = array<i64: 1, 32, 96>}, {transform_indices = @transform_12, window_bounds = array<i64: 1, 1, 96>}, {transform_indices = @transform_13, window_bounds = array<i64: 1, 1, 96>}, {transform_indices = @transform_14, window_bounds = array<i64: 1, 1, 32>}, {transform_indices = @transform_15, window_bounds = array<i64: 1, 1, 2, 32>}]} {
    %c0_i32 = arith.constant 0 : i32
    %0 = arith.cmpi eq, %arg1, %c0_i32 : i32
    %1 = arith.extui %0 : i1 to i32
    %c0_i32_0 = arith.constant 0 : i32
    %2 = arith.cmpi ne, %1, %c0_i32_0 : i32
    scf.if %2 {
      %cst_113 = arith.constant 0.000000e+00 : f32
      %266 = vector.broadcast %cst_113 : f32 to vector<8x2x32xf32>
      %c0_114 = arith.constant 0 : index
      %c0_115 = arith.constant 0 : index
      %c0_116 = arith.constant 0 : index
      %267 = vector.load %arg18[%c0_114, %c0_115, %c0_116] : memref<8x2x32xf32, #tpu.memory_space<vmem>>, vector<8x2x32xf32>
      tpu.vector_store %arg18[%c0_114, %c0_115, %c0_116], %266 {strides = array<i32>} : memref<8x2x32xf32, #tpu.memory_space<vmem>>, vector<8x2x32xf32>,
      %cst_117 = arith.constant 0.000000e+00 : f32
      %268 = vector.broadcast %cst_117 : f32 to vector<2x32xf32>
      %c0_118 = arith.constant 0 : index
      %c0_119 = arith.constant 0 : index
      %269 = vector.load %arg19[%c0_118, %c0_119] : memref<2x32xf32, #tpu.memory_space<vmem>>, vector<2x32xf32>
      tpu.vector_store %arg19[%c0_118, %c0_119], %268 {strides = array<i32>} : memref<2x32xf32, #tpu.memory_space<vmem>>, vector<2x32xf32>,
      %cst_120 = arith.constant 0.000000e+00 : f32
      %270 = vector.broadcast %cst_120 : f32 to vector<2x2x32xf32>
      %c0_121 = arith.constant 0 : index
      %c0_122 = arith.constant 0 : index
      %c0_123 = arith.constant 0 : index
      %271 = vector.load %arg20[%c0_121, %c0_122, %c0_123] : memref<2x2x32xf32, #tpu.memory_space<vmem>>, vector<2x2x32xf32>
      tpu.vector_store %arg20[%c0_121, %c0_122, %c0_123], %270 {strides = array<i32>} : memref<2x2x32xf32, #tpu.memory_space<vmem>>, vector<2x2x32xf32>,
      %cst_124 = arith.constant 0.000000e+00 : f32
      %272 = vector.broadcast %cst_124 : f32 to vector<2x32xf32>
      %c0_125 = arith.constant 0 : index
      %c0_126 = arith.constant 0 : index
      %273 = vector.load %arg21[%c0_125, %c0_126] : memref<2x32xf32, #tpu.memory_space<vmem>>, vector<2x32xf32>
      tpu.vector_store %arg21[%c0_125, %c0_126], %272 {strides = array<i32>} : memref<2x32xf32, #tpu.memory_space<vmem>>, vector<2x32xf32>,
    } else {
    }
    %c0 = arith.constant 0 : index
    %c0_1 = arith.constant 0 : index
    %c0_2 = arith.constant 0 : index
    %c0_3 = arith.constant 0 : index
    %3 = vector.load %arg2[%c0, %c0_1, %c0_2, %c0_3] : memref<1x1x2x32xf32, #tpu.memory_space<vmem>>, vector<1x1x2x32xf32>
    %4 = vector.shape_cast %3 : vector<1x1x2x32xf32> to vector<2x32xf32>
    %c0_4 = arith.constant 0 : index
    %c0_5 = arith.constant 0 : index
    %c0_6 = arith.constant 0 : index
    %c0_7 = arith.constant 0 : index
    %5 = vector.load %arg3[%c0_4, %c0_5, %c0_6, %c0_7] : memref<1x1x2x2xf32, #tpu.memory_space<vmem>>, vector<1x1x2x2xf32>
    %6 = vector.shape_cast %5 : vector<1x1x2x2xf32> to vector<2x2xf32>
    %7 = tpu.iota {dimensions = array<i32: 1>} : vector<2x2xi32>
    %cst = arith.constant dense<0xFF800000> : vector<2xf32>
    %8 = vector.multi_reduction <maximumf>, %6, %cst [1] : vector<2x2xf32> to vector<2xf32>
    %9 = vector.shape_cast %8 : vector<2xf32> to vector<2x1xf32>
    %10 = vector.broadcast %9 : vector<2x1xf32> to vector<2x2xf32>
    %11 = arith.cmpf oeq, %6, %10 : vector<2x2xf32>
    %c2_i32 = arith.constant 2 : i32
    %12 = vector.broadcast %c2_i32 : i32 to vector<2x2xi32>
    %13 = arith.select %11, %7, %12 : vector<2x2xi1>, vector<2x2xi32>
    %cst_8 = arith.constant dense<2147483647> : vector<2xi32>
    %14 = vector.multi_reduction <minsi>, %13, %cst_8 [1] : vector<2x2xi32> to vector<2xi32>
    %15 = vector.shape_cast %14 : vector<2xi32> to vector<2x1xi32>
    %16 = vector.broadcast %15 : vector<2x1xi32> to vector<2x2xi32>
    %17 = arith.cmpi eq, %7, %16 : vector<2x2xi32>
    %18 = arith.extui %17 : vector<2x2xi1> to vector<2x2xi32>
    %19 = arith.sitofp %18 : vector<2x2xi32> to vector<2x2xf32>
    %cst_9 = arith.constant 0.000000e+00 : f32
    %20 = vector.broadcast %cst_9 : f32 to vector<2x32xf32>
    %21 = vector.extract_strided_slice %19 {offsets = [0, 0], sizes = [2, 1], strides = [1, 1]} : vector<2x2xf32> to vector<2x1xf32>
    %c0_10 = arith.constant 0 : index
    %c0_11 = arith.constant 0 : index
    %c0_12 = arith.constant 0 : index
    %22 = vector.load %arg20[%c0_10, %c0_11, %c0_12] : memref<2x2x32xf32, #tpu.memory_space<vmem>>, vector<1x2x32xf32>
    %23 = vector.shape_cast %22 : vector<1x2x32xf32> to vector<2x32xf32>
    %24 = vector.broadcast %21 : vector<2x1xf32> to vector<2x32xf32>
    %25 = arith.mulf %24, %23 : vector<2x32xf32>
    %26 = arith.addf %20, %25 : vector<2x32xf32>
    %27 = vector.extract_strided_slice %19 {offsets = [0, 1], sizes = [2, 1], strides = [1, 1]} : vector<2x2xf32> to vector<2x1xf32>
    %c1 = arith.constant 1 : index
    %c0_13 = arith.constant 0 : index
    %c0_14 = arith.constant 0 : index
    %28 = vector.load %arg20[%c1, %c0_13, %c0_14] : memref<2x2x32xf32, #tpu.memory_space<vmem>>, vector<1x2x32xf32>
    %29 = vector.shape_cast %28 : vector<1x2x32xf32> to vector<2x32xf32>
    %30 = vector.broadcast %27 : vector<2x1xf32> to vector<2x32xf32>
    %31 = arith.mulf %30, %29 : vector<2x32xf32>
    %32 = arith.addf %26, %31 : vector<2x32xf32>
    %c0_15 = arith.constant 0 : index
    %c0_16 = arith.constant 0 : index
    %c0_17 = arith.constant 0 : index
    %33 = vector.load %arg4[%c0_15, %c0_16, %c0_17] : memref<1x64x96xf32, #tpu.memory_space<vmem>>, vector<1x64x96xf32>
    %34 = vector.shape_cast %33 : vector<1x64x96xf32> to vector<64x96xf32>
    %35 = vector.extract_strided_slice %34 {offsets = [0, 0], sizes = [32, 96], strides = [1, 1]} : vector<64x96xf32> to vector<32x96xf32>
    %cst_18 = arith.constant dense<0.000000e+00> : vector<2x96xf32>
    %36 = tpu.matmul %4, %35, %cst_18 {dimension_numbers = #tpu.dot_dimension_numbers<[1], [0], [0], [1], [0, 0, 1, 1], [], []>} : vector<2x32xf32>, vector<32x96xf32>, vector<2x96xf32> -> vector<2x96xf32>
    %37 = vector.extract_strided_slice %34 {offsets = [32, 0], sizes = [32, 96], strides = [1, 1]} : vector<64x96xf32> to vector<32x96xf32>
    %cst_19 = arith.constant dense<0.000000e+00> : vector<2x96xf32>
    %38 = tpu.matmul %32, %37, %cst_19 {dimension_numbers = #tpu.dot_dimension_numbers<[1], [0], [0], [1], [0, 0, 1, 1], [], []>} : vector<2x32xf32>, vector<32x96xf32>, vector<2x96xf32> -> vector<2x96xf32>
    %39 = arith.addf %36, %38 : vector<2x96xf32>
    %c0_20 = arith.constant 0 : index
    %c0_21 = arith.constant 0 : index
    %c0_22 = arith.constant 0 : index
    %40 = vector.load %arg6[%c0_20, %c0_21, %c0_22] : memref<1x1x96xf32, #tpu.memory_space<vmem>>, vector<1x1x96xf32>
    %41 = vector.shape_cast %40 : vector<1x1x96xf32> to vector<1x96xf32>
    %42 = vector.broadcast %41 : vector<1x96xf32> to vector<2x96xf32>
    %43 = arith.addf %39, %42 : vector<2x96xf32>
    %c0_23 = arith.constant 0 : index
    %c0_24 = arith.constant 0 : index
    %44 = vector.load %arg19[%c0_23, %c0_24] : memref<2x32xf32, #tpu.memory_space<vmem>>, vector<2x32xf32>
    %c0_25 = arith.constant 0 : index
    %c0_26 = arith.constant 0 : index
    %c0_27 = arith.constant 0 : index
    %45 = vector.load %arg5[%c0_25, %c0_26, %c0_27] : memref<1x32x96xf32, #tpu.memory_space<vmem>>, vector<1x32x96xf32>
    %46 = vector.shape_cast %45 : vector<1x32x96xf32> to vector<32x96xf32>
    %c0_28 = arith.constant 0 : index
    %c0_29 = arith.constant 0 : index
    %c0_30 = arith.constant 0 : index
    %47 = vector.load %arg7[%c0_28, %c0_29, %c0_30] : memref<1x1x96xf32, #tpu.memory_space<vmem>>, vector<1x1x96xf32>
    %48 = vector.shape_cast %47 : vector<1x1x96xf32> to vector<1x96xf32>
    %cst_31 = arith.constant dense<0.000000e+00> : vector<2x96xf32>
    %49 = tpu.matmul %44, %46, %cst_31 {dimension_numbers = #tpu.dot_dimension_numbers<[1], [0], [0], [1], [0, 0, 1, 1], [], []>} : vector<2x32xf32>, vector<32x96xf32>, vector<2x96xf32> -> vector<2x96xf32>
    %50 = vector.broadcast %48 : vector<1x96xf32> to vector<2x96xf32>
    %51 = arith.addf %49, %50 : vector<2x96xf32>
    %52 = vector.extract_strided_slice %43 {offsets = [0, 0], sizes = [2, 32], strides = [1, 1]} : vector<2x96xf32> to vector<2x32xf32>
    %53 = vector.extract_strided_slice %51 {offsets = [0, 0], sizes = [2, 32], strides = [1, 1]} : vector<2x96xf32> to vector<2x32xf32>
    %54 = arith.addf %52, %53 : vector<2x32xf32>
    %55 = arith.negf %54 : vector<2x32xf32>
    %56 = math.exp %55 : vector<2x32xf32>
    %cst_32 = arith.constant 1.000000e+00 : f32
    %57 = vector.broadcast %cst_32 : f32 to vector<2x32xf32>
    %58 = arith.addf %57, %56 : vector<2x32xf32>
    %59 = arith.divf %57, %58 : vector<2x32xf32>
    %60 = vector.extract_strided_slice %43 {offsets = [0, 32], sizes = [2, 32], strides = [1, 1]} : vector<2x96xf32> to vector<2x32xf32>
    %61 = vector.extract_strided_slice %51 {offsets = [0, 32], sizes = [2, 32], strides = [1, 1]} : vector<2x96xf32> to vector<2x32xf32>
    %62 = arith.addf %60, %61 : vector<2x32xf32>
    %63 = arith.negf %62 : vector<2x32xf32>
    %64 = math.exp %63 : vector<2x32xf32>
    %cst_33 = arith.constant 1.000000e+00 : f32
    %65 = vector.broadcast %cst_33 : f32 to vector<2x32xf32>
    %66 = arith.addf %65, %64 : vector<2x32xf32>
    %67 = arith.divf %65, %66 : vector<2x32xf32>
    %68 = vector.extract_strided_slice %43 {offsets = [0, 64], sizes = [2, 32], strides = [1, 1]} : vector<2x96xf32> to vector<2x32xf32>
    %69 = vector.extract_strided_slice %51 {offsets = [0, 64], sizes = [2, 32], strides = [1, 1]} : vector<2x96xf32> to vector<2x32xf32>
    %70 = arith.mulf %59, %69 : vector<2x32xf32>
    %71 = arith.addf %68, %70 : vector<2x32xf32>
    %72 = math.tanh %71 : vector<2x32xf32>
    %cst_34 = arith.constant 1.000000e+00 : f32
    %73 = vector.broadcast %cst_34 : f32 to vector<2x32xf32>
    %74 = arith.subf %73, %67 : vector<2x32xf32>
    %75 = arith.mulf %74, %72 : vector<2x32xf32>
    %76 = arith.mulf %67, %44 : vector<2x32xf32>
    %77 = arith.addf %75, %76 : vector<2x32xf32>
    %c0_35 = arith.constant 0 : index
    %c0_36 = arith.constant 0 : index
    %c0_37 = arith.constant 0 : index
    %78 = vector.load %arg18[%c0_35, %c0_36, %c0_37] : memref<8x2x32xf32, #tpu.memory_space<vmem>>, vector<8x2x32xf32>
    %c0_38 = arith.constant 0 : index
    %c0_39 = arith.constant 0 : index
    %c0_40 = arith.constant 0 : index
    %79 = vector.load %arg16[%c0_38, %c0_39, %c0_40] : memref<1x1x32xf32, #tpu.memory_space<vmem>>, vector<1x1x32xf32>
    %80 = vector.shape_cast %79 : vector<1x1x32xf32> to vector<1x32xf32>
    %81 = vector.shape_cast %80 : vector<1x32xf32> to vector<1x1x32xf32>
    %82 = vector.broadcast %81 : vector<1x1x32xf32> to vector<8x2x32xf32>
    %83 = arith.mulf %78, %82 : vector<8x2x32xf32>
    %cst_41 = arith.constant dense<0.000000e+00> : vector<8x2xf32>
    %84 = vector.multi_reduction <add>, %83, %cst_41 [2] : vector<8x2x32xf32> to vector<8x2xf32>
    %85 = vector.shape_cast %84 : vector<8x2xf32> to vector<8x2x1xf32>
    %86 = tpu.iota {dimensions = array<i32: 0>} : vector<8x2x1xi32>
    %87 = vector.broadcast %arg1 : i32 to vector<8x2x1xi32>
    %88 = arith.cmpi slt, %86, %87 : vector<8x2x1xi32>
    %89 = arith.extui %88 : vector<8x2x1xi1> to vector<8x2x1xi32>
    %90 = arith.sitofp %89 : vector<8x2x1xi32> to vector<8x2x1xf32>
    %cst_42 = arith.constant -1.000000e+30 : f32
    %91 = vector.broadcast %cst_42 : f32 to vector<8x2x1xf32>
    %92 = arith.select %88, %85, %91 : vector<8x2x1xi1>, vector<8x2x1xf32>
    %cst_43 = arith.constant dense<0xFF800000> : vector<2x1xf32>
    %93 = vector.multi_reduction <maximumf>, %92, %cst_43 [0] : vector<8x2x1xf32> to vector<2x1xf32>
    %94 = vector.shape_cast %93 : vector<2x1xf32> to vector<1x2x1xf32>
    %95 = vector.broadcast %94 : vector<1x2x1xf32> to vector<8x2x1xf32>
    %96 = arith.subf %92, %95 : vector<8x2x1xf32>
    %97 = math.exp %96 : vector<8x2x1xf32>
    %98 = arith.mulf %97, %90 : vector<8x2x1xf32>
    %cst_44 = arith.constant dense<0.000000e+00> : vector<2x1xf32>
    %99 = vector.multi_reduction <add>, %98, %cst_44 [0] : vector<8x2x1xf32> to vector<2x1xf32>
    %100 = vector.shape_cast %99 : vector<2x1xf32> to vector<1x2x1xf32>
    %cst_45 = arith.constant 1.000000e-30 : f32
    %101 = vector.broadcast %cst_45 : f32 to vector<1x2x1xf32>
    %102 = arith.maximumf %100, %101 : vector<1x2x1xf32>
    %103 = vector.broadcast %102 : vector<1x2x1xf32> to vector<8x2x1xf32>
    %104 = arith.divf %98, %103 : vector<8x2x1xf32>
    %105 = vector.broadcast %104 : vector<8x2x1xf32> to vector<8x2x32xf32>
    %106 = arith.mulf %105, %78 : vector<8x2x32xf32>
    %cst_46 = arith.constant dense<0.000000e+00> : vector<2x32xf32>
    %107 = vector.multi_reduction <add>, %106, %cst_46 [0] : vector<8x2x32xf32> to vector<2x32xf32>
    %c0_47 = arith.constant 0 : index
    %c0_48 = arith.constant 0 : index
    %c0_49 = arith.constant 0 : index
    %108 = vector.load %arg8[%c0_47, %c0_48, %c0_49] : memref<1x64x96xf32, #tpu.memory_space<vmem>>, vector<1x64x96xf32>
    %109 = vector.shape_cast %108 : vector<1x64x96xf32> to vector<64x96xf32>
    %110 = vector.extract_strided_slice %109 {offsets = [0, 0], sizes = [32, 96], strides = [1, 1]} : vector<64x96xf32> to vector<32x96xf32>
    %cst_50 = arith.constant dense<0.000000e+00> : vector<2x96xf32>
    %111 = tpu.matmul %4, %110, %cst_50 {dimension_numbers = #tpu.dot_dimension_numbers<[1], [0], [0], [1], [0, 0, 1, 1], [], []>} : vector<2x32xf32>, vector<32x96xf32>, vector<2x96xf32> -> vector<2x96xf32>
    %112 = vector.extract_strided_slice %109 {offsets = [32, 0], sizes = [32, 96], strides = [1, 1]} : vector<64x96xf32> to vector<32x96xf32>
    %cst_51 = arith.constant dense<0.000000e+00> : vector<2x96xf32>
    %113 = tpu.matmul %107, %112, %cst_51 {dimension_numbers = #tpu.dot_dimension_numbers<[1], [0], [0], [1], [0, 0, 1, 1], [], []>} : vector<2x32xf32>, vector<32x96xf32>, vector<2x96xf32> -> vector<2x96xf32>
    %114 = arith.addf %111, %113 : vector<2x96xf32>
    %c0_52 = arith.constant 0 : index
    %c0_53 = arith.constant 0 : index
    %c0_54 = arith.constant 0 : index
    %115 = vector.load %arg10[%c0_52, %c0_53, %c0_54] : memref<1x1x96xf32, #tpu.memory_space<vmem>>, vector<1x1x96xf32>
    %116 = vector.shape_cast %115 : vector<1x1x96xf32> to vector<1x96xf32>
    %117 = vector.broadcast %116 : vector<1x96xf32> to vector<2x96xf32>
    %118 = arith.addf %114, %117 : vector<2x96xf32>
    %c0_55 = arith.constant 0 : index
    %c0_56 = arith.constant 0 : index
    %c0_57 = arith.constant 0 : index
    %119 = vector.load %arg9[%c0_55, %c0_56, %c0_57] : memref<1x32x96xf32, #tpu.memory_space<vmem>>, vector<1x32x96xf32>
    %120 = vector.shape_cast %119 : vector<1x32x96xf32> to vector<32x96xf32>
    %c0_58 = arith.constant 0 : index
    %c0_59 = arith.constant 0 : index
    %c0_60 = arith.constant 0 : index
    %121 = vector.load %arg11[%c0_58, %c0_59, %c0_60] : memref<1x1x96xf32, #tpu.memory_space<vmem>>, vector<1x1x96xf32>
    %122 = vector.shape_cast %121 : vector<1x1x96xf32> to vector<1x96xf32>
    %cst_61 = arith.constant 0.000000e+00 : f32
    %123 = vector.broadcast %cst_61 : f32 to vector<2x32xf32>
    %c0_62 = arith.constant 0 : index
    %c0_63 = arith.constant 0 : index
    %c0_64 = arith.constant 0 : index
    %124 = vector.load %arg20[%c0_62, %c0_63, %c0_64] : memref<2x2x32xf32, #tpu.memory_space<vmem>>, vector<1x2x32xf32>
    %125 = vector.shape_cast %124 : vector<1x2x32xf32> to vector<2x32xf32>
    %cst_65 = arith.constant dense<0.000000e+00> : vector<2x96xf32>
    %126 = tpu.matmul %125, %120, %cst_65 {dimension_numbers = #tpu.dot_dimension_numbers<[1], [0], [0], [1], [0, 0, 1, 1], [], []>} : vector<2x32xf32>, vector<32x96xf32>, vector<2x96xf32> -> vector<2x96xf32>
    %127 = vector.broadcast %122 : vector<1x96xf32> to vector<2x96xf32>
    %128 = arith.addf %126, %127 : vector<2x96xf32>
    %129 = vector.extract_strided_slice %118 {offsets = [0, 0], sizes = [2, 32], strides = [1, 1]} : vector<2x96xf32> to vector<2x32xf32>
    %130 = vector.extract_strided_slice %128 {offsets = [0, 0], sizes = [2, 32], strides = [1, 1]} : vector<2x96xf32> to vector<2x32xf32>
    %131 = arith.addf %129, %130 : vector<2x32xf32>
    %132 = arith.negf %131 : vector<2x32xf32>
    %133 = math.exp %132 : vector<2x32xf32>
    %cst_66 = arith.constant 1.000000e+00 : f32
    %134 = vector.broadcast %cst_66 : f32 to vector<2x32xf32>
    %135 = arith.addf %134, %133 : vector<2x32xf32>
    %136 = arith.divf %134, %135 : vector<2x32xf32>
    %137 = vector.extract_strided_slice %118 {offsets = [0, 32], sizes = [2, 32], strides = [1, 1]} : vector<2x96xf32> to vector<2x32xf32>
    %138 = vector.extract_strided_slice %128 {offsets = [0, 32], sizes = [2, 32], strides = [1, 1]} : vector<2x96xf32> to vector<2x32xf32>
    %139 = arith.addf %137, %138 : vector<2x32xf32>
    %140 = arith.negf %139 : vector<2x32xf32>
    %141 = math.exp %140 : vector<2x32xf32>
    %cst_67 = arith.constant 1.000000e+00 : f32
    %142 = vector.broadcast %cst_67 : f32 to vector<2x32xf32>
    %143 = arith.addf %142, %141 : vector<2x32xf32>
    %144 = arith.divf %142, %143 : vector<2x32xf32>
    %145 = vector.extract_strided_slice %118 {offsets = [0, 64], sizes = [2, 32], strides = [1, 1]} : vector<2x96xf32> to vector<2x32xf32>
    %146 = vector.extract_strided_slice %128 {offsets = [0, 64], sizes = [2, 32], strides = [1, 1]} : vector<2x96xf32> to vector<2x32xf32>
    %147 = arith.mulf %136, %146 : vector<2x32xf32>
    %148 = arith.addf %145, %147 : vector<2x32xf32>
    %149 = math.tanh %148 : vector<2x32xf32>
    %cst_68 = arith.constant 1.000000e+00 : f32
    %150 = vector.broadcast %cst_68 : f32 to vector<2x32xf32>
    %151 = arith.subf %150, %144 : vector<2x32xf32>
    %152 = arith.mulf %151, %149 : vector<2x32xf32>
    %153 = arith.mulf %144, %125 : vector<2x32xf32>
    %154 = arith.addf %152, %153 : vector<2x32xf32>
    %155 = vector.extract_strided_slice %6 {offsets = [0, 0], sizes = [2, 1], strides = [1, 1]} : vector<2x2xf32> to vector<2x1xf32>
    %cst_69 = arith.constant 1.000000e+00 : f32
    %156 = vector.broadcast %cst_69 : f32 to vector<2x1xf32>
    %157 = arith.subf %156, %155 : vector<2x1xf32>
    %158 = vector.broadcast %157 : vector<2x1xf32> to vector<2x32xf32>
    %159 = arith.mulf %125, %158 : vector<2x32xf32>
    %160 = vector.broadcast %155 : vector<2x1xf32> to vector<2x32xf32>
    %161 = arith.mulf %154, %160 : vector<2x32xf32>
    %162 = arith.addf %159, %161 : vector<2x32xf32>
    %c0_70 = arith.constant 0 : index
    %c0_71 = arith.constant 0 : index
    %c0_72 = arith.constant 0 : index
    %163 = vector.load %arg20[%c0_70, %c0_71, %c0_72] : memref<2x2x32xf32, #tpu.memory_space<vmem>>, vector<1x2x32xf32>
    %164 = vector.shape_cast %163 : vector<1x2x32xf32> to vector<2x32xf32>
    %165 = vector.shape_cast %162 : vector<2x32xf32> to vector<1x2x32xf32>
    tpu.vector_store %arg20[%c0_70, %c0_71, %c0_72], %165 {strides = array<i32>} : memref<2x2x32xf32, #tpu.memory_space<vmem>>, vector<1x2x32xf32>,
    %166 = vector.extract_strided_slice %19 {offsets = [0, 0], sizes = [2, 1], strides = [1, 1]} : vector<2x2xf32> to vector<2x1xf32>
    %167 = vector.broadcast %166 : vector<2x1xf32> to vector<2x32xf32>
    %168 = arith.mulf %167, %162 : vector<2x32xf32>
    %169 = arith.addf %123, %168 : vector<2x32xf32>
    %c1_73 = arith.constant 1 : index
    %c0_74 = arith.constant 0 : index
    %c0_75 = arith.constant 0 : index
    %170 = vector.load %arg20[%c1_73, %c0_74, %c0_75] : memref<2x2x32xf32, #tpu.memory_space<vmem>>, vector<1x2x32xf32>
    %171 = vector.shape_cast %170 : vector<1x2x32xf32> to vector<2x32xf32>
    %cst_76 = arith.constant dense<0.000000e+00> : vector<2x96xf32>
    %172 = tpu.matmul %171, %120, %cst_76 {dimension_numbers = #tpu.dot_dimension_numbers<[1], [0], [0], [1], [0, 0, 1, 1], [], []>} : vector<2x32xf32>, vector<32x96xf32>, vector<2x96xf32> -> vector<2x96xf32>
    %173 = vector.broadcast %122 : vector<1x96xf32> to vector<2x96xf32>
    %174 = arith.addf %172, %173 : vector<2x96xf32>
    %175 = vector.extract_strided_slice %118 {offsets = [0, 0], sizes = [2, 32], strides = [1, 1]} : vector<2x96xf32> to vector<2x32xf32>
    %176 = vector.extract_strided_slice %174 {offsets = [0, 0], sizes = [2, 32], strides = [1, 1]} : vector<2x96xf32> to vector<2x32xf32>
    %177 = arith.addf %175, %176 : vector<2x32xf32>
    %178 = arith.negf %177 : vector<2x32xf32>
    %179 = math.exp %178 : vector<2x32xf32>
    %cst_77 = arith.constant 1.000000e+00 : f32
    %180 = vector.broadcast %cst_77 : f32 to vector<2x32xf32>
    %181 = arith.addf %180, %179 : vector<2x32xf32>
    %182 = arith.divf %180, %181 : vector<2x32xf32>
    %183 = vector.extract_strided_slice %118 {offsets = [0, 32], sizes = [2, 32], strides = [1, 1]} : vector<2x96xf32> to vector<2x32xf32>
    %184 = vector.extract_strided_slice %174 {offsets = [0, 32], sizes = [2, 32], strides = [1, 1]} : vector<2x96xf32> to vector<2x32xf32>
    %185 = arith.addf %183, %184 : vector<2x32xf32>
    %186 = arith.negf %185 : vector<2x32xf32>
    %187 = math.exp %186 : vector<2x32xf32>
    %cst_78 = arith.constant 1.000000e+00 : f32
    %188 = vector.broadcast %cst_78 : f32 to vector<2x32xf32>
    %189 = arith.addf %188, %187 : vector<2x32xf32>
    %190 = arith.divf %188, %189 : vector<2x32xf32>
    %191 = vector.extract_strided_slice %118 {offsets = [0, 64], sizes = [2, 32], strides = [1, 1]} : vector<2x96xf32> to vector<2x32xf32>
    %192 = vector.extract_strided_slice %174 {offsets = [0, 64], sizes = [2, 32], strides = [1, 1]} : vector<2x96xf32> to vector<2x32xf32>
    %193 = arith.mulf %182, %192 : vector<2x32xf32>
    %194 = arith.addf %191, %193 : vector<2x32xf32>
    %195 = math.tanh %194 : vector<2x32xf32>
    %cst_79 = arith.constant 1.000000e+00 : f32
    %196 = vector.broadcast %cst_79 : f32 to vector<2x32xf32>
    %197 = arith.subf %196, %190 : vector<2x32xf32>
    %198 = arith.mulf %197, %195 : vector<2x32xf32>
    %199 = arith.mulf %190, %171 : vector<2x32xf32>
    %200 = arith.addf %198, %199 : vector<2x32xf32>
    %201 = vector.extract_strided_slice %6 {offsets = [0, 1], sizes = [2, 1], strides = [1, 1]} : vector<2x2xf32> to vector<2x1xf32>
    %cst_80 = arith.constant 1.000000e+00 : f32
    %202 = vector.broadcast %cst_80 : f32 to vector<2x1xf32>
    %203 = arith.subf %202, %201 : vector<2x1xf32>
    %204 = vector.broadcast %203 : vector<2x1xf32> to vector<2x32xf32>
    %205 = arith.mulf %171, %204 : vector<2x32xf32>
    %206 = vector.broadcast %201 : vector<2x1xf32> to vector<2x32xf32>
    %207 = arith.mulf %200, %206 : vector<2x32xf32>
    %208 = arith.addf %205, %207 : vector<2x32xf32>
    %c1_81 = arith.constant 1 : index
    %c0_82 = arith.constant 0 : index
    %c0_83 = arith.constant 0 : index
    %209 = vector.load %arg20[%c1_81, %c0_82, %c0_83] : memref<2x2x32xf32, #tpu.memory_space<vmem>>, vector<1x2x32xf32>
    %210 = vector.shape_cast %209 : vector<1x2x32xf32> to vector<2x32xf32>
    %211 = vector.shape_cast %208 : vector<2x32xf32> to vector<1x2x32xf32>
    tpu.vector_store %arg20[%c1_81, %c0_82, %c0_83], %211 {strides = array<i32>} : memref<2x2x32xf32, #tpu.memory_space<vmem>>, vector<1x2x32xf32>,
    %212 = vector.extract_strided_slice %19 {offsets = [0, 1], sizes = [2, 1], strides = [1, 1]} : vector<2x2xf32> to vector<2x1xf32>
    %213 = vector.broadcast %212 : vector<2x1xf32> to vector<2x32xf32>
    %214 = arith.mulf %213, %208 : vector<2x32xf32>
    %215 = arith.addf %169, %214 : vector<2x32xf32>
    %c0_84 = arith.constant 0 : index
    %c0_85 = arith.constant 0 : index
    %c0_86 = arith.constant 0 : index
    %216 = vector.load %arg12[%c0_84, %c0_85, %c0_86] : memref<1x32x96xf32, #tpu.memory_space<vmem>>, vector<1x32x96xf32>
    %217 = vector.shape_cast %216 : vector<1x32x96xf32> to vector<32x96xf32>
    %cst_87 = arith.constant dense<0.000000e+00> : vector<2x96xf32>
    %218 = tpu.matmul %215, %217, %cst_87 {dimension_numbers = #tpu.dot_dimension_numbers<[1], [0], [0], [1], [0, 0, 1, 1], [], []>} : vector<2x32xf32>, vector<32x96xf32>, vector<2x96xf32> -> vector<2x96xf32>
    %c0_88 = arith.constant 0 : index
    %c0_89 = arith.constant 0 : index
    %c0_90 = arith.constant 0 : index
    %219 = vector.load %arg14[%c0_88, %c0_89, %c0_90] : memref<1x1x96xf32, #tpu.memory_space<vmem>>, vector<1x1x96xf32>
    %220 = vector.shape_cast %219 : vector<1x1x96xf32> to vector<1x96xf32>
    %221 = vector.broadcast %220 : vector<1x96xf32> to vector<2x96xf32>
    %222 = arith.addf %218, %221 : vector<2x96xf32>
    %c0_91 = arith.constant 0 : index
    %c0_92 = arith.constant 0 : index
    %223 = vector.load %arg21[%c0_91, %c0_92] : memref<2x32xf32, #tpu.memory_space<vmem>>, vector<2x32xf32>
    %c0_93 = arith.constant 0 : index
    %c0_94 = arith.constant 0 : index
    %c0_95 = arith.constant 0 : index
    %224 = vector.load %arg13[%c0_93, %c0_94, %c0_95] : memref<1x32x96xf32, #tpu.memory_space<vmem>>, vector<1x32x96xf32>
    %225 = vector.shape_cast %224 : vector<1x32x96xf32> to vector<32x96xf32>
    %c0_96 = arith.constant 0 : index
    %c0_97 = arith.constant 0 : index
    %c0_98 = arith.constant 0 : index
    %226 = vector.load %arg15[%c0_96, %c0_97, %c0_98] : memref<1x1x96xf32, #tpu.memory_space<vmem>>, vector<1x1x96xf32>
    %227 = vector.shape_cast %226 : vector<1x1x96xf32> to vector<1x96xf32>
    %cst_99 = arith.constant dense<0.000000e+00> : vector<2x96xf32>
    %228 = tpu.matmul %223, %225, %cst_99 {dimension_numbers = #tpu.dot_dimension_numbers<[1], [0], [0], [1], [0, 0, 1, 1], [], []>} : vector<2x32xf32>, vector<32x96xf32>, vector<2x96xf32> -> vector<2x96xf32>
    %229 = vector.broadcast %227 : vector<1x96xf32> to vector<2x96xf32>
    %230 = arith.addf %228, %229 : vector<2x96xf32>
    %231 = vector.extract_strided_slice %222 {offsets = [0, 0], sizes = [2, 32], strides = [1, 1]} : vector<2x96xf32> to vector<2x32xf32>
    %232 = vector.extract_strided_slice %230 {offsets = [0, 0], sizes = [2, 32], strides = [1, 1]} : vector<2x96xf32> to vector<2x32xf32>
    %233 = arith.addf %231, %232 : vector<2x32xf32>
    %234 = arith.negf %233 : vector<2x32xf32>
    %235 = math.exp %234 : vector<2x32xf32>
    %cst_100 = arith.constant 1.000000e+00 : f32
    %236 = vector.broadcast %cst_100 : f32 to vector<2x32xf32>
    %237 = arith.addf %236, %235 : vector<2x32xf32>
    %238 = arith.divf %236, %237 : vector<2x32xf32>
    %239 = vector.extract_strided_slice %222 {offsets = [0, 32], sizes = [2, 32], strides = [1, 1]} : vector<2x96xf32> to vector<2x32xf32>
    %240 = vector.extract_strided_slice %230 {offsets = [0, 32], sizes = [2, 32], strides = [1, 1]} : vector<2x96xf32> to vector<2x32xf32>
    %241 = arith.addf %239, %240 : vector<2x32xf32>
    %242 = arith.negf %241 : vector<2x32xf32>
    %243 = math.exp %242 : vector<2x32xf32>
    %cst_101 = arith.constant 1.000000e+00 : f32
    %244 = vector.broadcast %cst_101 : f32 to vector<2x32xf32>
    %245 = arith.addf %244, %243 : vector<2x32xf32>
    %246 = arith.divf %244, %245 : vector<2x32xf32>
    %247 = vector.extract_strided_slice %222 {offsets = [0, 64], sizes = [2, 32], strides = [1, 1]} : vector<2x96xf32> to vector<2x32xf32>
    %248 = vector.extract_strided_slice %230 {offsets = [0, 64], sizes = [2, 32], strides = [1, 1]} : vector<2x96xf32> to vector<2x32xf32>
    %249 = arith.mulf %238, %248 : vector<2x32xf32>
    %250 = arith.addf %247, %249 : vector<2x32xf32>
    %251 = math.tanh %250 : vector<2x32xf32>
    %cst_102 = arith.constant 1.000000e+00 : f32
    %252 = vector.broadcast %cst_102 : f32 to vector<2x32xf32>
    %253 = arith.subf %252, %246 : vector<2x32xf32>
    %254 = arith.mulf %253, %251 : vector<2x32xf32>
    %255 = arith.mulf %246, %223 : vector<2x32xf32>
    %256 = arith.addf %254, %255 : vector<2x32xf32>
    %257 = arith.index_cast %arg1 : i32 to index
    %c0_103 = arith.constant 0 : index
    %c0_104 = arith.constant 0 : index
    %258 = vector.load %arg18[%257, %c0_103, %c0_104] : memref<8x2x32xf32, #tpu.memory_space<vmem>>, vector<1x2x32xf32>
    %259 = vector.shape_cast %258 : vector<1x2x32xf32> to vector<2x32xf32>
    %260 = vector.shape_cast %77 : vector<2x32xf32> to vector<1x2x32xf32>
    tpu.vector_store %arg18[%257, %c0_103, %c0_104], %260 {strides = array<i32>} : memref<8x2x32xf32, #tpu.memory_space<vmem>>, vector<1x2x32xf32>,
    %c0_105 = arith.constant 0 : index
    %c0_106 = arith.constant 0 : index
    %261 = vector.load %arg19[%c0_105, %c0_106] : memref<2x32xf32, #tpu.memory_space<vmem>>, vector<2x32xf32>
    tpu.vector_store %arg19[%c0_105, %c0_106], %77 {strides = array<i32>} : memref<2x32xf32, #tpu.memory_space<vmem>>, vector<2x32xf32>,
    %c0_107 = arith.constant 0 : index
    %c0_108 = arith.constant 0 : index
    %262 = vector.load %arg21[%c0_107, %c0_108] : memref<2x32xf32, #tpu.memory_space<vmem>>, vector<2x32xf32>
    tpu.vector_store %arg21[%c0_107, %c0_108], %256 {strides = array<i32>} : memref<2x32xf32, #tpu.memory_space<vmem>>, vector<2x32xf32>,
    %c0_109 = arith.constant 0 : index
    %c0_110 = arith.constant 0 : index
    %c0_111 = arith.constant 0 : index
    %c0_112 = arith.constant 0 : index
    %263 = vector.load %arg17[%c0_109, %c0_110, %c0_111, %c0_112] : memref<1x1x2x32xf32, #tpu.memory_space<vmem>>, vector<1x1x2x32xf32>
    %264 = vector.shape_cast %263 : vector<1x1x2x32xf32> to vector<2x32xf32>
    %265 = vector.shape_cast %256 : vector<2x32xf32> to vector<1x1x2x32xf32>
    tpu.vector_store %arg17[%c0_109, %c0_110, %c0_111, %c0_112], %265 {strides = array<i32>} : memref<1x1x2x32xf32, #tpu.memory_space<vmem>>, vector<1x1x2x32xf32>,
    return
  }
  func.func @transform_0(%arg0: i32, %arg1: i32) -> (i32, i32, i32, i32) {
    %c0_i32 = arith.constant 0 : i32
    %c0_i32_0 = arith.constant 0 : i32
    %c0_i32_1 = arith.constant 0 : i32
    return %arg0, %arg1, %c0_i32, %c0_i32_0 : i32, i32, i32, i32
  }
  func.func @transform_1(%arg0: i32, %arg1: i32) -> (i32, i32, i32, i32) {
    %c0_i32 = arith.constant 0 : i32
    %c0_i32_0 = arith.constant 0 : i32
    %c0_i32_1 = arith.constant 0 : i32
    return %arg0, %arg1, %c0_i32, %c0_i32_0 : i32, i32, i32, i32
  }
  func.func @transform_2(%arg0: i32, %arg1: i32) -> (i32, i32, i32) {
    %c0_i32 = arith.constant 0 : i32
    %c0_i32_0 = arith.constant 0 : i32
    %c0_i32_1 = arith.constant 0 : i32
    return %arg0, %c0_i32, %c0_i32_0 : i32, i32, i32
  }
  func.func @transform_3(%arg0: i32, %arg1: i32) -> (i32, i32, i32) {
    %c0_i32 = arith.constant 0 : i32
    %c0_i32_0 = arith.constant 0 : i32
    %c0_i32_1 = arith.constant 0 : i32
    return %arg0, %c0_i32, %c0_i32_0 : i32, i32, i32
  }
  func.func @transform_4(%arg0: i32, %arg1: i32) -> (i32, i32, i32) {
    %c0_i32 = arith.constant 0 : i32
    %c0_i32_0 = arith.constant 0 : i32
    %c0_i32_1 = arith.constant 0 : i32
    return %arg0, %c0_i32, %c0_i32_0 : i32, i32, i32
  }
  func.func @transform_5(%arg0: i32, %arg1: i32) -> (i32, i32, i32) {
    %c0_i32 = arith.constant 0 : i32
    %c0_i32_0 = arith.constant 0 : i32
    %c0_i32_1 = arith.constant 0 : i32
    return %arg0, %c0_i32, %c0_i32_0 : i32, i32, i32
  }
  func.func @transform_6(%arg0: i32, %arg1: i32) -> (i32, i32, i32) {
    %c0_i32 = arith.constant 0 : i32
    %c0_i32_0 = arith.constant 0 : i32
    %c0_i32_1 = arith.constant 0 : i32
    return %arg0, %c0_i32, %c0_i32_0 : i32, i32, i32
  }
  func.func @transform_7(%arg0: i32, %arg1: i32) -> (i32, i32, i32) {
    %c0_i32 = arith.constant 0 : i32
    %c0_i32_0 = arith.constant 0 : i32
    %c0_i32_1 = arith.constant 0 : i32
    return %arg0, %c0_i32, %c0_i32_0 : i32, i32, i32
  }
  func.func @transform_8(%arg0: i32, %arg1: i32) -> (i32, i32, i32) {
    %c0_i32 = arith.constant 0 : i32
    %c0_i32_0 = arith.constant 0 : i32
    %c0_i32_1 = arith.constant 0 : i32
    return %arg0, %c0_i32, %c0_i32_0 : i32, i32, i32
  }
  func.func @transform_9(%arg0: i32, %arg1: i32) -> (i32, i32, i32) {
    %c0_i32 = arith.constant 0 : i32
    %c0_i32_0 = arith.constant 0 : i32
    %c0_i32_1 = arith.constant 0 : i32
    return %arg0, %c0_i32, %c0_i32_0 : i32, i32, i32
  }
  func.func @transform_10(%arg0: i32, %arg1: i32) -> (i32, i32, i32) {
    %c0_i32 = arith.constant 0 : i32
    %c0_i32_0 = arith.constant 0 : i32
    %c0_i32_1 = arith.constant 0 : i32
    return %arg0, %c0_i32, %c0_i32_0 : i32, i32, i32
  }
  func.func @transform_11(%arg0: i32, %arg1: i32) -> (i32, i32, i32) {
    %c0_i32 = arith.constant 0 : i32
    %c0_i32_0 = arith.constant 0 : i32
    %c0_i32_1 = arith.constant 0 : i32
    return %arg0, %c0_i32, %c0_i32_0 : i32, i32, i32
  }
  func.func @transform_12(%arg0: i32, %arg1: i32) -> (i32, i32, i32) {
    %c0_i32 = arith.constant 0 : i32
    %c0_i32_0 = arith.constant 0 : i32
    %c0_i32_1 = arith.constant 0 : i32
    return %arg0, %c0_i32, %c0_i32_0 : i32, i32, i32
  }
  func.func @transform_13(%arg0: i32, %arg1: i32) -> (i32, i32, i32) {
    %c0_i32 = arith.constant 0 : i32
    %c0_i32_0 = arith.constant 0 : i32
    %c0_i32_1 = arith.constant 0 : i32
    return %arg0, %c0_i32, %c0_i32_0 : i32, i32, i32
  }
  func.func @transform_14(%arg0: i32, %arg1: i32) -> (i32, i32, i32) {
    %c0_i32 = arith.constant 0 : i32
    %c0_i32_0 = arith.constant 0 : i32
    %c0_i32_1 = arith.constant 0 : i32
    return %arg0, %c0_i32, %c0_i32_0 : i32, i32, i32
  }
  func.func @transform_15(%arg0: i32, %arg1: i32) -> (i32, i32, i32, i32) {
    %c0_i32 = arith.constant 0 : i32
    %c0_i32_0 = arith.constant 0 : i32
    %c0_i32_1 = arith.constant 0 : i32
    return %arg0, %arg1, %c0_i32, %c0_i32_0 : i32, i32, i32, i32
  }
}

</mosaic_0001>

<bundles_post_ra>
// kernel: dialog_rnn_model_forward.3
= control target key start
LH: loop header
LB: loop body
LE: loop exit
PB: predicated region body
PF: predicated region fallthrough
CT: control target
= control target key end

     0   :  { %s1076_s27 = smov 0   ;;  %s1358_s0 = inlined_call_operand.vmem [shape: f32[8,2,64], index: 0, kind: input, shape index: {}]   ;;  %s1359_s1 = inlined_call_operand.vmem [shape: f32[8,2,1], index: 1, kind: input, shape index: {}]   ;;  %s1360_s2 = inlined_call_operand.vmem [shape: f32[64,64], index: 2, kind: input, shape index: {}]   ;;  %s1361_s3 = inlined_call_operand.vmem [shape: f32[1,64], index: 3, kind: input, shape index: {}]   ;;  %s1362_s4 = inlined_call_operand.vmem [shape: f32[64,32], index: 4, kind: input, shape index: {}]   ;;  %s1363_s5 = inlined_call_operand.vmem [shape: f32[1,32], index: 5, kind: input, shape index: {}]   ;;  %s1364_s6 = inlined_call_operand.vmem [shape: f32[32,7], index: 6, kind: input, shape index: {}]   ;;  %s1365_s7 = inlined_call_operand.vmem [shape: f32[1,7], index: 7, kind: input, shape index: {}]   ;;  %s1366_s8 = inlined_call_operand.vmem [shape: f32[8,2,7], index: 8, kind: output, shape index: {}]  }
   0x1 LB: > { %s1082_s28 = sadd.s32 4294967295, %s1026_s27   ;;  %p884_p0 = scmp.ge.s32.totalorder %s1026_s27, 1  ;;  %s1026_s27 = sphi %s1076_s27, %s18_s27  }
   0x2   : > { %p252_p1 = scmp.lt.s32.totalorder %s1026_s27, 9 }
   0x4   : > { %p253_p2 = pnand %p884_p0, %p252_p1 }
   0x5   : > { %s886_s25 = sshll.u32 (!%p253_p2), %s1082_s28, 1  ;;  %p280_p3 = scmp.lt.s32.totalorder (!%p253_p2), %s1082_s28, 7 }
   0x6   : > { %256 = sbr.rel (%p253_p2) target bundleno = 1342 (0x53e), region = 52  ;;  %s293_s16 = scalar_lea.vmem (!%p253_p2), %s1358_s0, %s886_s25 }
   0xb   : > { %v310_v0 = vld [vmem:[%s1360_s2 + $0x38] sm:$0xff]  ;;  %v1028_v1 = vmov 0.0   ;;  %v309_v2 = vld [vmem:[%s1360_s2 + $0x30] sm:$0xff]  ;;  %vm1029_vm0 = vmmov 0   ;;  %v1030_v3 = vmov 0   ;;  %v308_v4 = vld [vmem:[%s1360_s2 + $0x28] sm:$0xff] }
   0xc   : > { %918 = vmatprep.subr.mxu0 %v1028_v1  ;;  %934 = vmatprep.mubr.msk.f32.mxu0 %vm1029_vm0, %v1028_v1  ;;  %v1102_v5 = vld [vmem:[%s1359_s1 + $0x4] sm:$0x3]  ;;  %v1107_v6 = vld [vmem:[%s1359_s1] sm:$0x3]  ;;  %v1118_v8 = vld [vmem:[%s1359_s1 + $0x6] sm:$0x3] }
   0xd   : > { %919 = vmatpush3.msra.mxu0 %v310_v0  ;;  %979 = vset.pattern.permute.xlu1 %v1030_v3  ;;  %v307_v7 = vld [vmem:[%s1360_s2 + $0x20] sm:$0xff]  ;;  %v306_v10 = vld [vmem:[%s1360_s2 + $0x18] sm:$0xff]  ;;  %v305_v11 = vld [vmem:[%s1360_s2 + $0x10] sm:$0xff]  ;;  %vm318_vm1 = vcmask 523264   ;;  %vm448_vm2 = vcmask 517120   ;;  %vm489_vm3 = vcmask 1024  }
   0xe   : > { %920 = vmatprep.subr.mxu0 %v1028_v1  ;;  %978 = vset.pattern.permute.xlu0 %v1030_v3  ;;  %v1123_v9 = vld [vmem:[%s1359_s1 + $0x2] sm:$0x3]  ;;  %v1142_v12 = vld [vmem:[%s1359_s1 + $0xa] sm:$0x3]  ;;  %v1147_v13 = vld [vmem:[%s1359_s1 + $0x8] sm:$0x3] }
   0xf   : > { %921 = vmatpush3.msra.mxu0 %v309_v2  ;;  %404 = vperm.xlu1 %979, %v1102_v5   ;;  %v304_v14 = vld [vmem:[%s1360_s2 + $0x8] sm:$0xff]  ;;  %v303_v15 = vld [vmem:[%s1360_s2] sm:$0xff]  ;;  %vm749_vm4 = vcmask 261120   ;;  %vm823_vm5 = vcmask 50176   ;;  %s1368_s28 = smov (!%p280_p3, %s1082_s28), 7 }
  0x10   : > { %922 = vmatprep.subr.mxu0 %v1028_v1  ;;  %394 = vperm.xlu0 %978, %v1107_v6   ;;  %v1165_v16 = vld [vmem:[%s1359_s1 + $0xe] sm:$0x3]  ;;  %v294_v17 = vld [vmem:[%s293_s16] sm:$0x3]  ;;  %v1170_v18 = vld [vmem:[%s1359_s1 + $0xc] sm:$0x3] }
  0x11   : > { %923 = vmatpush3.msra.mxu0 %v308_v4  ;;  %937 = vmatprep.subr.mxu1 %v1028_v1  ;;  %v1182_v23 = vld [vmem:[%s1358_s0] sm:$0x3]  ;;  %v1187_v24 = vld [vmem:[%s1358_s0 + $0x2] sm:$0x3]  ;;  %v1192_v25 = vld [vmem:[%s1358_s0 + $0x4] sm:$0x3] }
  0x12   : > { %924 = vmatprep.subr.mxu0 %v1028_v1  ;;  %953 = vmatprep.mubr.msk.f32.mxu1 %vm1029_vm0, %v1028_v1  ;;  %v1197_v27 = vld [vmem:[%s1358_s0 + $0x8] sm:$0x3]  ;;  %v887_v28 = vld [vmem:[%s1361_s3] ss:$0 sm:$0xff]  ;;  %v1208_v33 = vld [vmem:[%s1358_s0 + $0x6] sm:$0x3] }
  0x13   : > { %925 = vmatpush3.msra.mxu0 %v307_v7  ;;  %409 = vperm.xlu1 %979, %v1118_v8   ;;  %v1214_v36 = vld [vmem:[%s1358_s0 + $0xc] sm:$0x3]  ;;  %v1221_v44 = vld [vmem:[%s1358_s0 + $0xa] sm:$0x3]  ;;  %v1231_v55 = vld [vmem:[%s1358_s0 + $0xe] sm:$0x3] }
  0x14   : > { %926 = vmatprep.subr.mxu0 %v1028_v1  ;;  %399 = vperm.xlu0 %978, %v1123_v9   ;;  %s885_s9 = sshll.u32 %s1368_s28, 1 }
  0x15   : > { %927 = vmatpush3.msra.mxu0 %v306_v10  ;;  %s283_s12 = scalar_lea.vmem %s1366_s8, %s885_s9 }
  0x16   : > { %928 = vmatprep.subr.mxu0 %v1028_v1 }
  0x17   : > { %929 = vmatpush3.msra.mxu0 %v305_v11  ;;  %419 = vperm.xlu1 %979, %v1142_v12  }
  0x18   : > { %930 = vmatprep.subr.mxu0 %v1028_v1  ;;  %414 = vperm.xlu0 %978, %v1147_v13  }
  0x19   : > { %931 = vmatpush3.msra.mxu0 %v304_v14 }
  0x1a   : > { %932 = vmatprep.subr.mxu0 %v1028_v1 }
  0x1b   : > { %933 = vmatpush3.msra.mxu0 %v303_v15  ;;  %429 = vperm.xlu1 %979, %v1165_v16  }
  0x1c   : > { %935 = vmatmul.mubr.msk.f32.vlgmr.msra.gmra.mxu0 %vm318_vm1, %v294_v17  ;;  %424 = vperm.xlu0 %978, %v1170_v18  }
  0x1d   : > { %956 = vmatprep.subr.mxu0 %v1028_v1  ;;  %964 = vmatprep.mubr.msk.f32.mxu0 %vm1029_vm0, %v1028_v1 }
  0x8a   : > { %v405_v21 = vpop.permute.xlu1 %404 }
  0x8b   : > { %v395_v19 = vpop.permute.xlu0 %394  ;;  %v434_v32 = vmul.f32 %v405_v21, %v1192_v25 }
  0x8c   : > { %v432_v29 = vmul.f32 %v395_v19, %v1182_v23 }
  0x8e   : > { %v410_v26 = vpop.permute.xlu1 %409 }
  0x8f   : > { %v400_v20 = vpop.permute.xlu0 %399  ;;  %v435_v41 = vmul.f32 %v410_v26, %v1208_v33 }
  0x90   : > { %v433_v30 = vmul.f32 %v400_v20, %v1187_v24 }
  0x92   : > { %v420_v42 = vpop.permute.xlu1 %419 }
  0x93   : > { %v415_v22 = vpop.permute.xlu0 %414  ;;  %v437_v49 = vmul.f32 %v420_v42, %v1221_v44 }
  0x94   : > { %v436_v34 = vmul.f32 %v415_v22, %v1197_v27 }
  0x96   : > { %v430_v54 = vpop.permute.xlu1 %429 }
  0x97   : > { %v425_v35 = vpop.permute.xlu0 %424  ;;  %v439_v56 = vmul.f32 %v430_v54, %v1231_v55 }
  0x98   : > { %v438_v43 = vmul.f32 %v425_v35, %v1214_v36 }
  0xdc   : > { %v388_v31 = vpop.f32.mrf.mxu0 }
  0xdd   : > { %v389_v37 = vadd.f32 %v887_v28, %v388_v31 }
  0xde   : > { %v936_v38 = vpop.f32.mrf.mxu0 }
  0xdf   : > { %v441_v39 = vmul.f32 %v433_v30, %v389_v37  ;;  %v440_v40 = vmul.f32 %v432_v29, %v389_v37  ;;  %v444_v47 = vmul.f32 %v436_v34, %v389_v37  ;;  %v442_v48 = vmul.f32 %v434_v32, %v389_v37 }
  0xe0   : > { %v446_v52 = vmul.f32 %v438_v43, %v389_v37  ;;  %v443_v53 = vmul.f32 %v435_v41, %v389_v37  ;;  %v445_v59 = vmul.f32 %v437_v49, %v389_v37  ;;  %v447_v61 = vmul.f32 %v439_v56, %v389_v37 }
  0xe1   : > { %v452_v45 = vsel %vm448_vm2, %v441_v39, 0.0  ;;  %v449_v46 = vsel %vm448_vm2, %v440_v40, 0.0  ;;  %v461_v50 = vsel %vm448_vm2, %v444_v47, 0.0  ;;  %v455_v51 = vsel %vm448_vm2, %v442_v48, 0.0 }
  0xe2   : > { %453 = vadd.xlane.f32.xlu1 %v452_v45  ;;  %450 = vadd.xlane.f32.xlu0 %v449_v46  ;;  %v467_v57 = vsel %vm448_vm2, %v446_v52, 0.0  ;;  %v458_v58 = vsel %vm448_vm2, %v443_v53, 0.0  ;;  %v464_v60 = vsel %vm448_vm2, %v445_v59, 0.0  ;;  %v470_v62 = vsel %vm448_vm2, %v447_v61, 0.0 }
  0xe6   : > { %462 = vadd.xlane.f32.xlu1 %v461_v50  ;;  %456 = vadd.xlane.f32.xlu0 %v455_v51 }
  0xea   : > { %468 = vadd.xlane.f32.xlu1 %v467_v57  ;;  %459 = vadd.xlane.f32.xlu0 %v458_v58 }
  0xee   : > { %465 = vadd.xlane.f32.xlu0 %v464_v60 }
  0xf2   : > { %471 = vadd.xlane.f32.xlu0 %v470_v62 }
 0x16b   : > { %v454_v63 = vpop.xlane.xlu1 %453  ;;  %v451_v0 = vpop.xlane.xlu0 %450 }
 0x16c   : > { %v474_v4 = vmul.f32 %v454_v63, %v1123_v9  ;;  %v473_v7 = vmul.f32 %v451_v0, %v1107_v6 }
 0x16e   : > { %980 = vtanh.f32 %v474_v4 }
 0x16f   : > { %v463_v2 = vpop.xlane.xlu1 %462  ;;  %v457_v3 = vpop.xlane.xlu0 %456  ;;  %982 = vtanh.f32 %v473_v7 }
 0x170   : > { %v477_v14 = vmul.f32 %v463_v2, %v1147_v13  ;;  %v475_v17 = vmul.f32 %v457_v3, %v1102_v5 }
 0x172   : > { %984 = vtanh.f32 %v477_v14 }
 0x173   : > { %v469_v10 = vpop.xlane.xlu1 %468  ;;  %v460_v11 = vpop.xlane.xlu0 %459 }
 0x174   : > { %v479_v15 = vmul.f32 %v469_v10, %v1170_v18  ;;  %v476_v20 = vmul.f32 %v460_v11, %v1118_v8 }
 0x176   : > { %986 = vtanh.f32 %v479_v15 }
 0x177   : > { %v466_v19 = vpop.xlane.xlu0 %465 }
 0x178   : > { %v478_v21 = vmul.f32 %v466_v19, %v1142_v12 }
 0x17a   : > { %988 = vtanh.f32 %v478_v21 }
 0x17b   : > { %990 = vtanh.f32 %v475_v17  ;;  %v472_v22 = vpop.xlane.xlu0 %471  ;;  %v981_v28 = vpop.eup %980 }
 0x17c   : > { %992 = vtanh.f32 %v476_v20  ;;  %v480_v26 = vmul.f32 %v472_v22, %v1165_v16  ;;  %v983_v29 = vpop.eup %982  ;;  %v491_v38 = vsel %vm489_vm3, %v981_v28, -inf }
 0x17d   : > { %v490_v43 = vsel %vm489_vm3, %v983_v29, -inf }
 0x17e   : > { %994 = vtanh.f32 %v480_v26 }
 0x17f   : > { %v985_v30 = vpop.eup %984 }
 0x180   : > { %v494_v39 = vsel %vm489_vm3, %v985_v30, -inf }
 0x181   : > { %v495_v48 = vmax.f32 %v490_v43, %v494_v39 }
 0x183   : > { %v987_v31 = vpop.eup %986 }
 0x184   : > { %v498_v40 = vsel %vm489_vm3, %v987_v31, -inf }
 0x187   : > { %v989_v32 = vpop.eup %988 }
 0x188   : > { %v991_v34 = vpop.eup %990  ;;  %v496_v35 = vsel %vm489_vm3, %v989_v32, -inf }
 0x189   : > { %v993_v37 = vpop.eup %992  ;;  %v497_v42 = vmax.f32 %v491_v38, %v496_v35  ;;  %v492_v45 = vsel %vm489_vm3, %v991_v34, -inf }
 0x18a   : > { %v493_v46 = vsel %vm489_vm3, %v993_v37, -inf  ;;  %v499_v49 = vmax.f32 %v492_v45, %v498_v40 }
 0x18b   : > { %v995_v41 = vpop.eup %994  ;;  %v502_v51 = vmax.f32 %v495_v48, %v497_v42 }
 0x18c   : > { %v500_v47 = vsel %vm489_vm3, %v995_v41, -inf }
 0x18d   : > { %v501_v50 = vmax.f32 %v493_v46, %v500_v47 }
 0x18f   : > { %v503_v52 = vmax.f32 %v499_v49, %v501_v50 }
 0x191   : > { %v504_v53 = vmax.f32 %v502_v51, %v503_v52 }
 0x193   : > { %v505_v54 = vsub.f32 %v983_v29, %v504_v53  ;;  %v506_v56 = vsub.f32 %v981_v28, %v504_v53  ;;  %v507_v57 = vsub.f32 %v991_v34, %v504_v53  ;;  %v508_v58 = vsub.f32 %v993_v37, %v504_v53 }
 0x194   : > { %v509_v59 = vsub.f32 %v985_v30, %v504_v53  ;;  %v510_v63 = vsub.f32 %v989_v32, %v504_v53  ;;  %v511_v2 = vsub.f32 %v987_v31, %v504_v53  ;;  %v512_v4 = vsub.f32 %v995_v41, %v504_v53 }
 0x195   : > { %v513_v60 = vmul.f32 1.442695, %v505_v54  ;;  %v515_v61 = vmul.f32 1.442695, %v506_v56  ;;  %v517_v62 = vmul.f32 1.442695, %v507_v57 }
 0x196   : > { %v519_v0 = vmul.f32 1.442695, %v508_v58  ;;  %v521_v3 = vmul.f32 1.442695, %v509_v59  ;;  %v523_v7 = vmul.f32 1.442695, %v510_v63 }
 0x197   : > { %996 = vpow2.f32 %v513_v60  ;;  %v525_v10 = vmul.f32 1.442695, %v511_v2  ;;  %v527_v11 = vmul.f32 1.442695, %v512_v4 }
 0x198   : > { %998 = vpow2.f32 %v515_v61 }
 0x199   : > { %1000 = vpow2.f32 %v517_v62 }
 0x19a   : > { %1002 = vpow2.f32 %v519_v0 }
 0x19b   : > { %1004 = vpow2.f32 %v521_v3 }
 0x19c   : > { %1006 = vpow2.f32 %v523_v7 }
 0x19d   : > { %1008 = vpow2.f32 %v525_v10 }
 0x19e   : > { %1010 = vpow2.f32 %v527_v11 }
 0x1a4   : > { %v997_v14 = vpop.eup %996 }
 0x1a5   : > { %v999_v15 = vpop.eup %998  ;;  %v529_v17 = vsel %vm489_vm3, %v997_v14, 0.0 }
 0x1a6   : > { %v1001_v19 = vpop.eup %1000  ;;  %v530_v20 = vsel %vm489_vm3, %v999_v15, 0.0 }
 0x1a7   : > { %v1003_v21 = vpop.eup %1002  ;;  %v531_v22 = vadd.f32 %v530_v20, %v529_v17  ;;  %v532_v26 = vsel %vm489_vm3, %v1001_v19, 0.0 }
 0x1a8   : > { %v1005_v28 = vpop.eup %1004  ;;  %v534_v30 = vsel %vm489_vm3, %v1003_v21, 0.0 }
 0x1a9   : > { %v533_v29 = vadd.f32 %v532_v26, %v531_v22  ;;  %v1007_v31 = vpop.eup %1006  ;;  %v536_v34 = vsel %vm489_vm3, %v1005_v28, 0.0 }
 0x1aa   : > { %v1009_v35 = vpop.eup %1008  ;;  %v538_v38 = vsel %vm489_vm3, %v1007_v31, 0.0 }
 0x1ab   : > { %v535_v32 = vadd.f32 %v534_v30, %v533_v29  ;;  %v1011_v39 = vpop.eup %1010  ;;  %v540_v41 = vsel %vm489_vm3, %v1009_v35, 0.0  ;;  %v655_v29 = vld [vmem:[%s1362_s4 + $0x30] sm:$0xff]  ;;  %v654_v30 = vld [vmem:[%s1362_s4 + $0x28] sm:$0xff] }
 0x1ac   : > { %v542_v43 = vsel %vm489_vm3, %v1011_v39, 0.0 }
 0x1ad   : > { %v537_v37 = vadd.f32 %v536_v34, %v535_v32  ;;  %v653_v32 = vld [vmem:[%s1362_s4 + $0x20] sm:$0xff]  ;;  %v652_v34 = vld [vmem:[%s1362_s4 + $0x18] sm:$0xff] }
 0x1af   : > { %v539_v40 = vadd.f32 %v538_v38, %v537_v37  ;;  %v651_v37 = vld [vmem:[%s1362_s4 + $0x10] sm:$0xff]  ;;  %v650_v38 = vld [vmem:[%s1362_s4 + $0x8] sm:$0xff] }
 0x1b1   : > { %v541_v42 = vadd.f32 %v540_v41, %v539_v40  ;;  %v649_v40 = vld [vmem:[%s1362_s4] sm:$0xff] }
 0x1b3   : > { %v543_v45 = vadd.f32 %v542_v43, %v541_v42 }
 0x1b5   : > { %1012 = vrcp.f32 %v543_v45 }
 0x1c2   : > { %v1013_v46 = vpop.eup %1012 }
 0x1c3   : > { %v545_v47 = vmul.f32 %v1013_v46, %v997_v14  ;;  %v546_v48 = vmul.f32 %v1013_v46, %v999_v15  ;;  %v547_v49 = vmul.f32 %v1013_v46, %v1001_v19  ;;  %v548_v50 = vmul.f32 %v1013_v46, %v1003_v21 }
 0x1c4   : > { %v549_v51 = vmul.f32 %v1013_v46, %v1005_v28  ;;  %v550_v56 = vmul.f32 %v1013_v46, %v1007_v31  ;;  %v551_v61 = vmul.f32 %v1013_v46, %v1009_v35  ;;  %v552_v2 = vmul.f32 %v1013_v46, %v1011_v39  ;;  %v741_v39 = vld [vmem:[%s1364_s6 + $0x18] sm:$0xff] }
 0x1c5   : > { %v553_v52 = vmul.f32 %v545_v47, %v1107_v6  ;;  %v554_v53 = vmul.f32 %v546_v48, %v1123_v9  ;;  %v555_v54 = vmul.f32 %v547_v49, %v1102_v5  ;;  %v556_v57 = vmul.f32 %v548_v50, %v1118_v8  ;;  %957 = vmatpush3.msra.mxu0 %v741_v39 }
 0x1c6   : > { %v557_v62 = vmul.f32 %v549_v51, %v1147_v13  ;;  %v558_v6 = vmul.f32 %v550_v56, %v1142_v12  ;;  %v559_v3 = vmul.f32 %v551_v61, %v1170_v18  ;;  %v560_v7 = vmul.f32 %v552_v2, %v1165_v16  ;;  %v656_v16 = vld [vmem:[%s1362_s4 + $0x38] sm:$0xff]  ;;  %958 = vmatprep.subr.mxu0 %v1028_v1 }
 0x1c7   : > { %v561_v58 = vsel %vm489_vm3, %v553_v52, 0.0  ;;  %v562_v59 = vsel %vm489_vm3, %v554_v53, 0.0  ;;  %v564_v63 = vsel %vm489_vm3, %v555_v54, 0.0  ;;  %v566_v9 = vsel %vm489_vm3, %v556_v57, 0.0  ;;  %938 = vmatpush3.msra.mxu1 %v656_v16 }
 0x1c8   : > { %v563_v60 = vadd.f32 %v562_v59, %v561_v58  ;;  %v568_v8 = vsel %vm489_vm3, %v557_v62, 0.0  ;;  %v570_v10 = vsel %vm489_vm3, %v558_v6, 0.0  ;;  %v572_v13 = vsel %vm489_vm3, %v559_v3, 0.0  ;;  %939 = vmatprep.subr.mxu1 %v1028_v1 }
 0x1c9   : > { %v574_v15 = vsel %vm489_vm3, %v560_v7, 0.0  ;;  %940 = vmatpush3.msra.mxu1 %v655_v29 }
 0x1ca   : > { %v565_v0 = vadd.f32 %v564_v63, %v563_v60  ;;  %941 = vmatprep.subr.mxu1 %v1028_v1 }
 0x1cb   : > { %942 = vmatpush3.msra.mxu1 %v654_v30 }
 0x1cc   : > { %v567_v5 = vadd.f32 %v566_v9, %v565_v0  ;;  %943 = vmatprep.subr.mxu1 %v1028_v1 }
 0x1cd   : > { %944 = vmatpush3.msra.mxu1 %v653_v32 }
 0x1ce   : > { %v569_v4 = vadd.f32 %v568_v8, %v567_v5  ;;  %945 = vmatprep.subr.mxu1 %v1028_v1 }
 0x1cf   : > { %946 = vmatpush3.msra.mxu1 %v652_v34 }
 0x1d0   : > { %v571_v11 = vadd.f32 %v570_v10, %v569_v4  ;;  %947 = vmatprep.subr.mxu1 %v1028_v1 }
 0x1d1   : > { %948 = vmatpush3.msra.mxu1 %v651_v37 }
 0x1d2   : > { %v573_v14 = vadd.f32 %v572_v13, %v571_v11  ;;  %949 = vmatprep.subr.mxu1 %v1028_v1  ;;  %v891_v11 = vld [vmem:[%s1365_s7] ss:$0 sm:$0xff] }
 0x1d3   : > { %950 = vmatpush3.msra.mxu1 %v650_v38 }
 0x1d4   : > { %v575_v17 = vadd.f32 %v574_v15, %v573_v14  ;;  %951 = vmatprep.subr.mxu1 %v1028_v1 }
 0x1d5   : > { %952 = vmatpush3.msra.mxu1 %v649_v40 }
 0x1d6   : > { %v576_v12 = vmax.f32 %v575_v17, 1e-30 }
 0x1d8   : > { %1014 = vrcp.f32 %v576_v12 }
 0x1e5   : > { %v1015_v19 = vpop.eup %1014 }
 0x1e6   : > { %v579_v20 = vmul.f32 %v1015_v19, %v554_v53  ;;  %v578_v21 = vmul.f32 %v1015_v19, %v553_v52  ;;  %v582_v18 = vmul.f32 %v1015_v19, %v557_v62  ;;  %v580_v22 = vmul.f32 %v1015_v19, %v555_v54 }
 0x1e7   : > { %v584_v26 = vmul.f32 %v1015_v19, %v559_v3  ;;  %v581_v28 = vmul.f32 %v1015_v19, %v556_v57  ;;  %v583_v31 = vmul.f32 %v1015_v19, %v558_v6  ;;  %v585_v35 = vmul.f32 %v1015_v19, %v560_v7  ;;  %v889_v3 = vld [vmem:[%s1363_s5] ss:$0 sm:$0xff] }
 0x1e8   : > { %593 = vperm.xlu0 %978, %v579_v20   ;;  %588 = vperm.xlu1 %979, %v578_v21  }
 0x1ec   : > { %608 = vperm.xlu0 %978, %v582_v18   ;;  %598 = vperm.xlu1 %979, %v580_v22  }
 0x1f0   : > { %618 = vperm.xlu0 %978, %v584_v26   ;;  %603 = vperm.xlu1 %979, %v581_v28  }
 0x1f4   : > { %613 = vperm.xlu1 %979, %v583_v31  }
 0x1f8   : > { %623 = vperm.xlu1 %979, %v585_v35  }
 0x263   : > { %v594_v41 = vpop.permute.xlu0 %593  ;;  %v589_v42 = vpop.permute.xlu1 %588 }
 0x264   : > { %v627_v43 = vmul.f32 %v594_v41, %v1187_v24  ;;  %v626_v45 = vmul.f32 %v589_v42, %v1182_v23 }
 0x266   : > { %v635_v48 = vsel %vm448_vm2, %v627_v43, 0.0  ;;  %v634_v49 = vsel %vm448_vm2, %v626_v45, 0.0 }
 0x267   : > { %v609_v46 = vpop.permute.xlu0 %608  ;;  %v599_v47 = vpop.permute.xlu1 %598  ;;  %v636_v52 = vadd.f32 %v635_v48, %v634_v49 }
 0x268   : > { %v628_v50 = vmul.f32 %v599_v47, %v1192_v25  ;;  %v630_v54 = vmul.f32 %v609_v46, %v1197_v27 }
 0x26a   : > { %v637_v51 = vsel %vm448_vm2, %v628_v50, 0.0  ;;  %v641_v60 = vsel %vm448_vm2, %v630_v54, 0.0 }
 0x26b   : > { %v604_v53 = vpop.permute.xlu1 %603  ;;  %v638_v57 = vadd.f32 %v637_v51, %v636_v52  ;;  %v619_v24 = vpop.permute.xlu0 %618 }
 0x26c   : > { %v629_v56 = vmul.f32 %v604_v53, %v1208_v33  ;;  %v632_v61 = vmul.f32 %v619_v24, %v1214_v36  ;;  %v740_v36 = vld [vmem:[%s1364_s6 + $0x10] sm:$0xff] }
 0x26d   : > { %959 = vmatpush3.msra.mxu0 %v740_v36 }
 0x26e   : > { %v639_v23 = vsel %vm448_vm2, %v629_v56, 0.0  ;;  %v645_v27 = vsel %vm448_vm2, %v632_v61, 0.0  ;;  %960 = vmatprep.subr.mxu0 %v1028_v1 }
 0x26f   : > { %v640_v58 = vadd.f32 %v639_v23, %v638_v57  ;;  %v614_v59 = vpop.permute.xlu1 %613 }
 0x270   : > { %v631_v25 = vmul.f32 %v614_v59, %v1221_v44  ;;  %v739_v44 = vld [vmem:[%s1364_s6 + $0x8] sm:$0xff] }
 0x271   : > { %v642_v62 = vadd.f32 %v641_v60, %v640_v58  ;;  %961 = vmatpush3.msra.mxu0 %v739_v44 }
 0x272   : > { %v643_v63 = vsel %vm448_vm2, %v631_v25, 0.0  ;;  %962 = vmatprep.subr.mxu0 %v1028_v1 }
 0x273   : > { %v644_v0 = vadd.f32 %v643_v63, %v642_v62  ;;  %v624_v2 = vpop.permute.xlu1 %623 }
 0x274   : > { %v633_v33 = vmul.f32 %v624_v2, %v1231_v55  ;;  %v738_v55 = vld [vmem:[%s1364_s6] sm:$0xff] }
 0x275   : > { %v646_v6 = vadd.f32 %v645_v27, %v644_v0  ;;  %963 = vmatpush3.msra.mxu0 %v738_v55 }
 0x276   : > { %v647_v9 = vsel %vm448_vm2, %v633_v33, 0.0 }
 0x277   : > { %v648_v5 = vadd.f32 %v647_v9, %v646_v6 }
 0x279   : > { %954 = vmatmul.mubr.msk.f32.vlgmr.msra.gmra.mxu1 %vm318_vm1, %v648_v5 }
 0x339   : > { %v733_v8 = vpop.f32.mrf.mxu1 }
 0x33a   : > { %v734_v4 = vadd.f32 %v889_v3, %v733_v8 }
 0x33b   : > { %v955_v7 = vpop.f32.mrf.mxu1 }
 0x33c   : > { %v737_v10 = vmax.f32 %v734_v4, 0.0 }
 0x33e   : > { %965 = vmatmul.mubr.msk.f32.vlgmr.msra.gmra.mxu0 %vm749_vm4, %v737_v10 }
 0x3fe   : > { %v819_v13 = vpop.f32.mrf.mxu0 }
 0x3ff   : > { %v820_v1 = vadd.f32 %v891_v11, %v819_v13 }
 0x400   : > { %v966_v14 = vpop.f32.mrf.mxu0 }
 0x401   : > { %v824_v15 = vsel %vm823_vm5, %v820_v1, -inf }
 0x402   : > { %825 = vmax.xlane.f32.xlu0 %v824_v15 }
 0x48b   : > { %v826_v17 = vpop.xlane.xlu0 %825 }
 0x48c   : > { %v827_v12 = vsub.f32 %v820_v1, %v826_v17 }
 0x48e   : > { %v828_v19 = vmul.f32 1.442695, %v827_v12 }
 0x490   : > { %1016 = vpow2.f32 %v828_v19 }
 0x49d   : > { %v1017_v20 = vpop.eup %1016 }
 0x49e   : > { %v830_v21 = vsel %vm823_vm5, %v1017_v20, 0.0 }
 0x49f   : > { %831 = vadd.xlane.f32.xlu1 %v830_v21 }
 0x528   : > { %v832_v18 = vpop.xlane.xlu1 %831 }
 0x529   : > { %1018 = vlog2.f32 %v832_v18 }
 0x536   : > { %v1019_v22 = vpop.eup %1018 }
 0x537   : > { %v834_v16 = vmul.f32 0.6931472, %v1019_v22 }
 0x539   : > { %v835_v26 = vadd.f32 %v834_v16, %v826_v17 }
 0x53b   : > { %v836_v28 = vsub.f32 %v820_v1, %v835_v26 }
 0x53d   : > { %837 = vst.msk [vmem:[%s283_s12] sm:$0x3] %vm823_vm5, %v836_v28 }
 0x53e PF: > { %s18_s27 = sadd.s32 1, %s1026_s27  }
 0x53f   : > { %p15_p4 = scmp.ge.s32.totalorder %s18_s27, 10  }
 0x541   :  { %17 = sbr.rel (!%p15_p4) target bundleno = 1 (0x1), region = 80 }

// kernel: dialog_rnn_model_forward.2
= control target key start
LH: loop header
LB: loop body
LE: loop exit
PB: predicated region body
PF: predicated region fallthrough
CT: control target
= control target key end

     0   :  { %s2586_s18 = smov 0   ;;  %s2588_s19 = smov 0   ;;  %s3061_s0 = inlined_call_operand.vmem [shape: f32[2,8,2,32], index: 0, kind: input, shape index: {}]   ;;  %s3062_s1 = inlined_call_operand.vmem [shape: f32[2,8,2,2], index: 1, kind: input, shape index: {}]   ;;  %s3063_s2 = inlined_call_operand.vmem [shape: f32[2,64,96], index: 2, kind: input, shape index: {}]   ;;  %s3064_s3 = inlined_call_operand.vmem [shape: f32[2,32,96], index: 3, kind: input, shape index: {}]   ;;  %s3065_s4 = inlined_call_operand.vmem [shape: f32[2,1,96], index: 4, kind: input, shape index: {}]   ;;  %s3066_s5 = inlined_call_operand.vmem [shape: f32[2,1,96], index: 5, kind: input, shape index: {}]   ;;  %s3067_s6 = inlined_call_operand.vmem [shape: f32[2,64,96], index: 6, kind: input, shape index: {}]   ;;  %s3068_s7 = inlined_call_operand.vmem [shape: f32[2,32,96], index: 7, kind: input, shape index: {}]   ;;  %s3069_s8 = inlined_call_operand.vmem [shape: f32[2,1,96], index: 8, kind: input, shape index: {}]   ;;  %s3070_s9 = inlined_call_operand.vmem [shape: f32[2,1,96], index: 9, kind: input, shape index: {}]   ;;  %s3071_s10 = inlined_call_operand.vmem [shape: f32[2,32,96], index: 10, kind: input, shape index: {}]   ;;  %s3072_s11 = inlined_call_operand.vmem [shape: f32[2,32,96], index: 11, kind: input, shape index: {}]   ;;  %s3073_s12 = inlined_call_operand.vmem [shape: f32[2,1,96], index: 12, kind: input, shape index: {}]   ;;  %s3074_s13 = inlined_call_operand.vmem [shape: f32[2,1,96], index: 13, kind: input, shape index: {}]   ;;  %s3075_s14 = inlined_call_operand.vmem [shape: f32[2,1,32], index: 14, kind: input, shape index: {}]   ;;  %s3076_s15 = inlined_call_operand.vmem [shape: f32[2,8,2,32], index: 15, kind: output, shape index: {}]  }
   0x1   :  { %3084 = sst [smem:[#allocation14_spill]] %s3063_s2  ;;  %s2590_s20 = smov 0  }
   0x2   :  { %3085 = sst [smem:[#allocation15_spill]] %s3064_s3  ;;  %s2592_s21 = smov 0  }
   0x3   :  { %3086 = sst [smem:[#allocation16_spill]] %s3065_s4  ;;  %s2594_s22 = smov 0  }
   0x4   :  { %3087 = sst [smem:[#allocation17_spill]] %s3066_s5 }
   0x5   :  { %3088 = sst [smem:[#allocation18_spill]] %s3067_s6 }
   0x6   :  { %3089 = sst [smem:[#allocation19_spill]] %s3068_s7 }
   0x7   :  { %3090 = sst [smem:[#allocation20_spill]] %s3071_s10 }
   0x8   :  { %3091 = sst [smem:[#allocation21_spill]] %s3073_s12 }
   0x9   :  { %3092 = sst [smem:[#allocation22_spill]] %s3074_s13 }
   0xa   :  { %3093 = sst [smem:[#allocation23_spill]] %s3075_s14 }
   0xb   :  { %3094 = sst [smem:[#allocation24_spill]] %s3076_s15 }
   0xc LB: > { %3095 = sst [smem:[#allocation6_spill]] %s2480_s18  ;;  %s34_s23 = sadd.s32 1, %s2488_s20  ;;  %s2496_s22 = sphi %s2594_s22, %s25_s22   ;;  %s2492_s21 = sphi %s2592_s21, %s3133_s21   ;;  %s2488_s20 = sphi %s2590_s20, %s3132_s20   ;;  %s2484_s19 = sphi %s2588_s19, %s3131_s19   ;;  %s2480_s18 = sphi %s2586_s18, %s3130_s18  }
   0xd   : > { %3096 = sst [smem:[#allocation7_spill]] %s2488_s20  ;;  %s37_s24 = sadd.s32 1, %s2492_s21 }
   0xe   : > { %3097 = sst [smem:[#allocation8_spill]] %s2492_s21  ;;  %p35_p0 = scmp.ge.s32.totalorder %s34_s23, 8 }
   0xf   : > { %3098 = sst [smem:[#allocation9_spill]] %s2496_s22  ;;  %p2161_p1 = scmp.ge.s32.totalorder %s2496_s22, 1 }
  0x10   : > { %p587_p2 = scmp.lt.s32.totalorder %s2496_s22, 17  ;;  %s3135_s23 = smov (%p35_p0, %s34_s23), 0 }
  0x11   : > { %3099 = sst [smem:[#allocation10_spill]] %s3135_s23  ;;  %s3137_s24 = smov (!%p35_p0, %s37_s24), %s2492_s21 }
  0x12   : > { %p588_p3 = pnand %p2161_p1, %p587_p2  ;;  %p39_p4 = scmp.ge.s32.totalorder %s3137_s24, 2 }
  0x14   : > { %s3139_s24 = smov (%p39_p4, %s3137_s24), 0  ;;  %591 = sbr.rel (%p588_p3) target bundleno = 1928 (0x788), region = 80 }
  0x15   : > { %3100 = sst [smem:[#allocation11_spill]] %s3139_s24 }
  0x19   : > { %p700_p5 = scmp.lt.s32.totalorder %s2484_s19, 1  ;;  %p702_p6 = scmp.lt.s32.totalorder %s2480_s18, 7 }
  0x1a   : > { %s3101_s2 = sld [smem:[#allocation14_spill]] }
  0x1b   : > { %s3141_s19 = smov (!%p700_p5, %s2484_s19), 1  ;;  %s3103_s3 = sld [smem:[#allocation15_spill]] }
  0x1c   : > { %s703_s25 = scalar_select %p702_p6, %s2480_s18, 7 }
  0x1d   : > { %s2162_s26 = sshll.u32 %s3141_s19, 3  ;;  %s2213_s27 = sshll.u32 %s3141_s19, 6 }
  0x1e   : > { %s705_s28 = sadd.s32 %s2162_s26, %s703_s25  ;;  %s2214_s24 = sshll.u32 %s3141_s19, 5 }
  0x1f   : > { %s2629_s17 = sshll.u32 %s705_s28, 1  ;;  %s3106_s6 = sld [smem:[#allocation18_spill]] }
  0x20   : > { %s2627_s16 = scalar_lea.vmem %s3101_s2, %s2213_s27  ;;  %s3107_s7 = sld [smem:[#allocation19_spill]] }
  0x21   : > { %3102 = sst [smem:[#allocation12_spill]] %s2627_s16  ;;  %s2643_s30 = scalar_lea.vmem %s3103_s3, %s2214_s24 }
  0x22   : > { %s3108_s10 = sld [smem:[#allocation20_spill]]  ;;  %s2679_s21 = scalar_lea.vmem %s3072_s11, %s2214_s24 }
  0x23   : > { %s3110_s3 = sld [smem:[#allocation21_spill]] }
  0x24   : > { %s3111_s25 = sld [smem:[#allocation22_spill]] }
  0x25   : > { %s2656_s23 = scalar_lea.vmem %s3106_s6, %s2213_s27  ;;  %s3112_s16 = sld [smem:[#allocation23_spill]] }
  0x26   : > { %s2661_s20 = scalar_lea.vmem %s3107_s7, %s2214_s24 }
  0x28   : > { %s2674_s13 = scalar_lea.vmem %s3108_s10, %s2214_s24  ;;  %s3113_s10 = sld [smem:[#allocation24_spill]] }
  0x29   : > { %3109 = sst [smem:[#allocation13_spill]] %s2674_s13  ;;  %s760_s6 = scalar_lea.vmem %s3110_s3, %s3141_s19 }
  0x2a   : > { %s763_s7 = scalar_lea.vmem %s3111_s25, %s3141_s19  ;;  %s3114_s13 = sld [smem:[#allocation6_spill]] }
  0x2b   : > { %s766_s4 = scalar_lea.vmem %s3112_s16, %s3141_s19 }
  0x2e   : > { %s774_s5 = scalar_lea.vmem %s3113_s10, %s2629_s17 }
  0x30   : > { %p2180_p7 = scmp.ne.s32.totalorder %s3114_s13, 0 }
  0x32   : > { %778 = sbr.rel (%p2180_p7) target bundleno = 62 (0x3e), region = 84 }
  0x37   : > { %vm779_vm0 = vcmask 254976   ;;  %v2498_v0 = vmov 0.0  }
  0x38   : > { %780 = vst.msk [vmem:[#allocation2] sm:$0x3] %vm779_vm0, %v2498_v0  ;;  %781 = vst.msk [vmem:[#allocation2 + $0x2] sm:$0x3] %vm779_vm0, %v2498_v0 }
  0x39   : > { %782 = vst.msk [vmem:[#allocation2 + $0x4] sm:$0x3] %vm779_vm0, %v2498_v0  ;;  %783 = vst.msk [vmem:[#allocation2 + $0x6] sm:$0x3] %vm779_vm0, %v2498_v0 }
  0x3a   : > { %784 = vst.msk [vmem:[#allocation2 + $0x8] sm:$0x3] %vm779_vm0, %v2498_v0  ;;  %785 = vst.msk [vmem:[#allocation2 + $0xa] sm:$0x3] %vm779_vm0, %v2498_v0 }
  0x3b   : > { %786 = vst.msk [vmem:[#allocation2 + $0xc] sm:$0x3] %vm779_vm0, %v2498_v0  ;;  %787 = vst.msk [vmem:[#allocation2 + $0xe] sm:$0x3] %vm779_vm0, %v2498_v0 }
  0x3c   : > { %788 = vst.msk [vmem:[#allocation3] sm:$0x3] %vm779_vm0, %v2498_v0  ;;  %789 = vst.msk [vmem:[#allocation4] sm:$0x3] %vm779_vm0, %v2498_v0 }
  0x3d   : > { %790 = vst.msk [vmem:[#allocation4 + $0x2] sm:$0x3] %vm779_vm0, %v2498_v0  ;;  %791 = vst.msk [vmem:[#allocation5] sm:$0x3] %vm779_vm0, %v2498_v0 }
  0x3e PF: > { %s3115_s13 = scalar_lea.vmem %s3062_s1, %s2629_s17  ;;  %vm796_vm1 = vcmask 9216   ;;  %v2188_v4 = vld [vmem:[%s766_s4] ss:$0 sm:$0xff]  ;;  %vm1136_vm2 = vcmask 254976   ;;  %v794_v7 = vlaneseq  ;;  %v2499_v26 = vmov 0.0   ;;  %s3116_s4 = sld [smem:[#allocation12_spill]] }
  0x3f   : > { %v2703_v1 = vld [vmem:[%s3115_s13] sm:$0x3]  ;;  %v2714_v14 = vld [vmem:[#allocation2 + $0x2] sm:$0x3]  ;;  %2275 = vmatprep.subr.mxu1 %v2499_v26  ;;  %2264 = vmatprep.subr.mxu0 %v2499_v26  ;;  %v2500_v40 = vmov 1   ;;  %v2501_v41 = vmov 0   ;;  %s3117_s25 = scalar_lea.vmem %s3061_s0, %s2629_s17  ;;  %s3120_s26 = scalar_lea.vmem %s3069_s8, %s3141_s19 }
  0x40   : > { %v797_v2 = vsel %vm796_vm1, %v2703_v1, -inf  ;;  %v2706_v3 = vld [vmem:[#allocation2] sm:$0x3]  ;;  %v2710_v8 = vand.u32 127, %v794_v7  ;;  %v1129_v15 = vmul.f32 %v2188_v4, %v2714_v14  ;;  %v2718_v17 = vld [vmem:[#allocation2 + $0x6] sm:$0x3]  ;;  %2412 = vset.pattern.permute.xlu0 %v2500_v40  ;;  %2411 = vset.pattern.permute.xlu1 %v2501_v41 }
  0x41   : > { %798 = vmax.xlane.f32.xlu0 %v797_v2  ;;  %v1128_v5 = vmul.f32 %v2188_v4, %v2706_v3  ;;  %v1131_v18 = vmul.f32 %v2188_v4, %v2718_v17  ;;  %v2722_v20 = vld [vmem:[#allocation2 + $0xa] sm:$0x3]  ;;  %v2732_v28 = vld [vmem:[#allocation2 + $0x4] sm:$0x3]  ;;  %v2738_v32 = vld [vmem:[#allocation2 + $0x8] sm:$0x3] }
  0x42   : > { %v1140_v16 = vsel %vm1136_vm2, %v1129_v15, 0.0  ;;  %v1133_v21 = vmul.f32 %v2188_v4, %v2722_v20  ;;  %v2726_v23 = vld [vmem:[#allocation2 + $0xe] sm:$0x3]  ;;  %v1130_v31 = vmul.f32 %v2188_v4, %v2732_v28  ;;  %v1132_v35 = vmul.f32 %v2188_v4, %v2738_v32  ;;  %v2742_v36 = vld [vmem:[#allocation2 + $0xc] sm:$0x3]  ;;  %v1297_v47 = vld [vmem:[%s2656_s23 + $0x38] sm:$0xff] }
  0x43   : > { %v1137_v6 = vsel %vm1136_vm2, %v1128_v5, 0.0  ;;  %v1146_v19 = vsel %vm1136_vm2, %v1131_v18, 0.0  ;;  %v1135_v24 = vmul.f32 %v2188_v4, %v2726_v23  ;;  %v1134_v38 = vmul.f32 %v2188_v4, %v2742_v36  ;;  %v2761_v46 = vld [vmem:[%s3117_s25] sm:$0x3]  ;;  %v1296_v48 = vld [vmem:[%s2656_s23 + $0x30] sm:$0xff]  ;;  %v1295_v49 = vld [vmem:[%s2656_s23 + $0x28] sm:$0xff] }
  0x44   : > { %1138 = vadd.xlane.f32.xlu1 %v1137_v6  ;;  %v1152_v22 = vsel %vm1136_vm2, %v1133_v21, 0.0  ;;  %v1143_v34 = vsel %vm1136_vm2, %v1130_v31, 0.0  ;;  %v1149_v37 = vsel %vm1136_vm2, %v1132_v35, 0.0  ;;  %v839_v42 = vld [vmem:[%s3116_s4 + $0x18] sm:$0xff]  ;;  %v838_v43 = vld [vmem:[%s3116_s4 + $0x10] sm:$0xff]  ;;  %v837_v44 = vld [vmem:[%s3116_s4 + $0x8] sm:$0xff] }
  0x45   : > { %v1158_v25 = vsel %vm1136_vm2, %v1135_v24, 0.0  ;;  %v1155_v39 = vsel %vm1136_vm2, %v1134_v38, 0.0  ;;  %2276 = vmatpush3.msra.mxu1 %v839_v42  ;;  %v836_v45 = vld [vmem:[%s3116_s4] sm:$0xff]  ;;  %vm844_vm5 = vcmask 261120   ;;  %vm2502_vm6 = vmmov 0   ;;  %s3118_s12 = sld [smem:[#allocation6_spill]] }
  0x46   : > { %2277 = vmatprep.subr.mxu1 %v2499_v26  ;;  %2283 = vmatprep.mubr.msk.f32.mxu1 %vm2502_vm6, %v2499_v26  ;;  %v1294_v50 = vld [vmem:[%s2656_s23 + $0x20] sm:$0xff]  ;;  %v843_v51 = vld [vmem:[%s3116_s4 + $0x38] sm:$0xff]  ;;  %v842_v52 = vld [vmem:[%s3116_s4 + $0x30] sm:$0xff]  ;;  %vm1194_vm15 = vcmask 1041408   ;;  %s2503_s27 = smov 64   ;;  %s2504_s29 = smov 32  }
  0x47   : > { %2278 = vmatpush3.msra.mxu1 %v838_v43  ;;  %2272 = vmatprep.mubr.msk.f32.mxu0 %vm2502_vm6, %v2499_v26  ;;  %v841_v4 = vld [vmem:[%s3116_s4 + $0x28] sm:$0xff]  ;;  %v840_v7 = vld [vmem:[%s3116_s4 + $0x20] sm:$0xff]  ;;  %s2505_s2 = smov 96   ;;  %s3121_s28 = sld [smem:[#allocation13_spill]] }
  0x48   : > { %2279 = vmatprep.subr.mxu1 %v2499_v26  ;;  %2265 = vmatpush3.msra.mxu0 %v843_v51  ;;  %s3122_s15 = sld [smem:[#allocation17_spill]] }
  0x49   : > { %2280 = vmatpush3.msra.mxu1 %v837_v44  ;;  %2266 = vmatprep.subr.mxu0 %v2499_v26  ;;  %s3124_s4 = sld [smem:[#allocation16_spill]] }
  0x4a   : > { %2281 = vmatprep.subr.mxu1 %v2499_v26  ;;  %2267 = vmatpush3.msra.mxu0 %v842_v52 }
  0x4b   : > { %2282 = vmatpush3.msra.mxu1 %v836_v45  ;;  %2268 = vmatprep.subr.mxu0 %v2499_v26  ;;  %v2786_v60 = vstv %s3118_s12 }
  0x4c   : > { %2297 = vmatprep.subr.mxu1 %v2499_v26  ;;  %2284 = vmatmul.mubr.msk.f32.vlgmr.msra.gmra.mxu1 %vm844_vm5, %v2761_v46  ;;  %vm1163_vm7 = vcmp.gt.s32.totalorder %v2786_v60, 1  ;;  %vm1165_vm8 = vcmp.gt.s32.totalorder %v2786_v60, 3  ;;  %vm1167_vm9 = vcmp.gt.s32.totalorder %v2786_v60, 5  ;;  %vm1169_vm10 = vcmp.gt.s32.totalorder %v2786_v60, 7 }
  0x4d   : > { %2298 = vmatpush3.msra.mxu1 %v1297_v47  ;;  %2305 = vmatprep.mubr.msk.f32.mxu1 %vm2502_vm6, %v2499_v26  ;;  %vm1162_vm11 = vcmp.gt.s32.totalorder %v2786_v60, 0  ;;  %vm1164_vm13 = vcmp.gt.s32.totalorder %v2786_v60, 2  ;;  %vm1166_vm14 = vcmp.gt.s32.totalorder %v2786_v60, 4  ;;  %vm1168_vm0 = vcmp.gt.s32.totalorder %v2786_v60, 6 }
  0x4e   : > { %2299 = vmatprep.subr.mxu1 %v2499_v26  ;;  %2269 = vmatpush3.msra.mxu0 %v841_v4  ;;  %s3123_s3 = scalar_lea.vmem %s3122_s15, %s3141_s19 }
  0x4f   : > { %2300 = vmatpush3.msra.mxu1 %v1296_v48  ;;  %2270 = vmatprep.subr.mxu0 %v2499_v26  ;;  %s3125_s24 = scalar_lea.vmem %s3124_s4, %s3141_s19 }
  0x50   : > { %2301 = vmatprep.subr.mxu1 %v2499_v26  ;;  %2271 = vmatpush3.msra.mxu0 %v840_v7 }
  0x51   : > { %2302 = vmatpush3.msra.mxu1 %v1295_v49  ;;  %2286 = vmatprep.subr.mxu0 %v2499_v26 }
  0x52   : > { %2303 = vmatprep.subr.mxu1 %v2499_v26 }
  0x53   : > { %2304 = vmatpush3.msra.mxu1 %v1294_v50 }
  0x54   : > { %2319 = vmatprep.subr.mxu1 %v2499_v26 }
  0xca   : > { %v799_v9 = vpop.xlane.xlu0 %798 }
  0xcb   : > { %vm800_vm3 = vcmp.eq.f32.partialorder %v2703_v1, %v799_v9 }
  0xcc   : > { %v801_v10 = vsel %vm800_vm3, %v2710_v8, 2 }
  0xcd   : > { %v802_v11 = vsel %vm796_vm1, %v801_v10, 2147483647  ;;  %v1139_v55 = vpop.xlane.xlu1 %1138 }
  0xce   : > { %v804_v12 = vshra.s32 %v802_v11, 16  ;;  %v803_v27 = vand.u32 65535, %v802_v11  ;;  %v1186_v10 = vsel %vm1162_vm11, %v1139_v55, -1e+30 }
  0xd0   : > { %v806_v13 = vcvt.s32.f32 %v804_v12  ;;  %v805_v30 = vcvt.s32.f32 %v803_v27 }
  0xd2   : > { %807 = vmin.xlane.f32.xlu0 %v806_v13 }
  0xd6   : > { %1141 = vadd.xlane.f32.xlu0 %v1140_v16 }
  0xda   : > { %1147 = vadd.xlane.f32.xlu0 %v1146_v19 }
  0xde   : > { %1153 = vadd.xlane.f32.xlu0 %v1152_v22  ;;  %v1195_v22 = vsel %vm1194_vm15, %v1186_v10, -inf }
  0xe2   : > { %1159 = vadd.xlane.f32.xlu0 %v1158_v25 }
 0x15b   : > { %v2734_v29 = vpop.xlane.xlu0 %807 }
 0x15c   : > { %vm809_vm4 = vcmp.eq.f32.partialorder %v806_v13, %v2734_v29  ;;  %v814_v56 = vcvt.f32.s32 %v2734_v29 }
 0x15d   : > { %v810_v33 = vsel %vm809_vm4, %v805_v30, inf }
 0x15e   : > { %811 = vmin.xlane.f32.xlu1 %v810_v33  ;;  %v815_v59 = vshll.u32 %v814_v56, 16 }
 0x15f   : > { %v1142_v53 = vpop.xlane.xlu0 %1141 }
 0x160   : > { %v1187_v2 = vsel %vm1163_vm7, %v1142_v53, -1e+30 }
 0x161   : > { %v1196_v12 = vsel %vm1194_vm15, %v1187_v2, -inf }
 0x162   : > { %1144 = vadd.xlane.f32.xlu1 %v1143_v34 }
 0x163   : > { %v1148_v54 = vpop.xlane.xlu0 %1147 }
 0x164   : > { %v1189_v5 = vsel %vm1165_vm8, %v1148_v54, -1e+30 }
 0x165   : > { %v1198_v13 = vsel %vm1194_vm15, %v1189_v5, -inf }
 0x166   : > { %1150 = vadd.xlane.f32.xlu1 %v1149_v37 }
 0x167   : > { %v1154_v57 = vpop.xlane.xlu0 %1153 }
 0x168   : > { %v1191_v9 = vsel %vm1167_vm9, %v1154_v57, -1e+30  ;;  %v2189_v57 = vsel %vm1162_vm11, 1.0, %v2499_v26 }
 0x169   : > { %v1201_v18 = vsel %vm1194_vm15, %v1191_v9, -inf }
 0x16a   : > { %1156 = vadd.xlane.f32.xlu1 %v1155_v39  ;;  %v1202_v27 = vmax.f32 %v1196_v12, %v1201_v18 }
 0x16b   : > { %v1160_v0 = vpop.xlane.xlu0 %1159 }
 0x1e7   : > { %v812_v58 = vpop.xlane.xlu1 %811 }
 0x1e8   : > { %v813_v61 = vcvt.f32.s32 %v812_v58  ;;  %v2190_v58 = vsel %vm1163_vm7, 1.0, %v2499_v26 }
 0x1ea   : > { %v816_v62 = vadd.s32 %v815_v59, %v813_v61  ;;  %v2191_v61 = vsel %vm1164_vm13, 1.0, %v2499_v26 }
 0x1eb   : > { %v1145_v63 = vpop.xlane.xlu1 %1144 }
 0x1ec   : > { %vm817_vm12 = vcmp.eq.s32.totalorder %v2710_v8, %v816_v62  ;;  %v1193_v8 = vsel %vm1169_vm10, %v1160_v0, -1e+30  ;;  %v1188_v15 = vsel %vm1164_vm13, %v1145_v63, -1e+30  ;;  %v2192_v63 = vsel %vm1165_vm8, 1.0, %v2499_v26 }
 0x1ed   : > { %v2181_v6 = vsel %vm817_vm12, 1.0, %v2499_v26  ;;  %v1205_v21 = vsel %vm1194_vm15, %v1193_v8, -inf  ;;  %v1197_v24 = vsel %vm1194_vm15, %v1188_v15, -inf }
 0x1ee   : > { %831 = vperm.xlu0 %2412, %v2181_v6   ;;  %823 = vperm.xlu1 %2411, %v2181_v6   ;;  %v1206_v30 = vmax.f32 %v1198_v13, %v1205_v21  ;;  %v2193_v6 = vsel %vm1166_vm14, 1.0, %v2499_v26  ;;  %v2194_v13 = vsel %vm1167_vm9, 1.0, %v2499_v26  ;;  %v2195_v21 = vsel %vm1168_vm0, 1.0, %v2499_v26 }
 0x1ef   : > { %v1151_v11 = vpop.xlane.xlu1 %1150 }
 0x1f0   : > { %v1190_v16 = vsel %vm1166_vm14, %v1151_v11, -1e+30 }
 0x1f1   : > { %v1199_v19 = vsel %vm1194_vm15, %v1190_v16, -inf }
 0x1f2   : > { %2414 = vset.pattern.permute.xlu0 %v2501_v41  ;;  %v1200_v29 = vmax.f32 %v1195_v22, %v1199_v19 }
 0x1f3   : > { %v1157_v25 = vpop.xlane.xlu1 %1156 }
 0x1f4   : > { %v1192_v31 = vsel %vm1168_vm0, %v1157_v25, -1e+30  ;;  %v1207_v35 = vmax.f32 %v1200_v29, %v1202_v27  ;;  %v2196_v29 = vsel %vm1169_vm10, 1.0, %v2499_v26 }
 0x1f5   : > { %v1203_v33 = vsel %vm1194_vm15, %v1192_v31, -inf }
 0x1f6   : > { %v1204_v34 = vmax.f32 %v1197_v24, %v1203_v33 }
 0x1f8   : > { %v1208_v37 = vmax.f32 %v1204_v34, %v1206_v30 }
 0x1fa   : > { %v1209_v38 = vmax.f32 %v1207_v35, %v1208_v37 }
 0x1fc   : > { %v1210_v39 = vsub.f32 %v1186_v10, %v1209_v38  ;;  %v1211_v42 = vsub.f32 %v1187_v2, %v1209_v38  ;;  %v1212_v41 = vsub.f32 %v1188_v15, %v1209_v38  ;;  %v1213_v43 = vsub.f32 %v1189_v5, %v1209_v38 }
 0x1fd   : > { %v1214_v44 = vsub.f32 %v1190_v16, %v1209_v38  ;;  %v1215_v45 = vsub.f32 %v1191_v9, %v1209_v38  ;;  %v1216_v50 = vsub.f32 %v1192_v31, %v1209_v38  ;;  %v1217_v53 = vsub.f32 %v1193_v8, %v1209_v38 }
 0x1fe   : > { %v1218_v47 = vmul.f32 1.442695, %v1210_v39  ;;  %v1220_v48 = vmul.f32 1.442695, %v1211_v42  ;;  %v1222_v49 = vmul.f32 1.442695, %v1212_v41 }
 0x1ff   : > { %v1224_v51 = vmul.f32 1.442695, %v1213_v43  ;;  %v1226_v52 = vmul.f32 1.442695, %v1214_v44  ;;  %v1228_v54 = vmul.f32 1.442695, %v1215_v45 }
 0x200   : > { %2416 = vpow2.f32 %v1218_v47  ;;  %v1230_v55 = vmul.f32 1.442695, %v1216_v50  ;;  %v1232_v56 = vmul.f32 1.442695, %v1217_v53 }
 0x201   : > { %2418 = vpow2.f32 %v1220_v48 }
 0x202   : > { %2420 = vpow2.f32 %v1222_v49 }
 0x203   : > { %2422 = vpow2.f32 %v1224_v51 }
 0x204   : > { %2424 = vpow2.f32 %v1226_v52 }
 0x205   : > { %2426 = vpow2.f32 %v1228_v54 }
 0x206   : > { %2428 = vpow2.f32 %v1230_v55 }
 0x207   : > { %2430 = vpow2.f32 %v1232_v56 }
 0x20d   : > { %v2417_v59 = vpop.eup %2416 }
 0x20e   : > { %v2419_v62 = vpop.eup %2418  ;;  %v1234_v0 = vmul.f32 %v2417_v59, %v2189_v57 }
 0x20f   : > { %v2421_v2 = vpop.eup %2420  ;;  %v1235_v4 = vmul.f32 %v2419_v62, %v2190_v58 }
 0x210   : > { %v2423_v5 = vpop.eup %2422  ;;  %v1236_v7 = vmul.f32 %v2421_v2, %v2191_v61  ;;  %v1242_v9 = vsel %vm1194_vm15, %v1234_v0, 0.0 }
 0x211   : > { %v2425_v8 = vpop.eup %2424  ;;  %v1237_v10 = vmul.f32 %v2423_v5, %v2192_v63  ;;  %v1243_v11 = vsel %vm1194_vm15, %v1235_v4, 0.0 }
 0x212   : > { %v2427_v12 = vpop.eup %2426  ;;  %v1244_v15 = vadd.f32 %v1243_v11, %v1242_v9  ;;  %v1238_v16 = vmul.f32 %v2425_v8, %v2193_v6  ;;  %v1245_v18 = vsel %vm1194_vm15, %v1236_v7, 0.0  ;;  %v1450_v11 = vld [vmem:[%s2661_s20 + $0x8] sm:$0xff] }
 0x213   : > { %v2429_v19 = vpop.eup %2428  ;;  %v1239_v24 = vmul.f32 %v2427_v12, %v2194_v13  ;;  %v1247_v25 = vsel %vm1194_vm15, %v1237_v10, 0.0  ;;  %v2884_v12 = vld [vmem:[#allocation4] sm:$0x3]  ;;  %v829_v13 = vld [vmem:[#allocation4 + $0x2] sm:$0x3] }
 0x214   : > { %v1246_v22 = vadd.f32 %v1245_v18, %v1244_v15  ;;  %v2431_v27 = vpop.eup %2430  ;;  %v1240_v31 = vmul.f32 %v2429_v19, %v2195_v21  ;;  %v1249_v33 = vsel %vm1194_vm15, %v1238_v16, 0.0 }
 0x215   : > { %v1241_v35 = vmul.f32 %v2431_v27, %v2196_v29  ;;  %v1251_v37 = vsel %vm1194_vm15, %v1239_v24, 0.0  ;;  %v1000_v27 = vld [vmem:[%s2643_s30] sm:$0xff]  ;;  %v2908_v29 = vld [vmem:[#allocation3] sm:$0x3] }
 0x216   : > { %v1248_v30 = vadd.f32 %v1247_v25, %v1246_v22  ;;  %v1253_v39 = vsel %vm1194_vm15, %v1240_v31, 0.0  ;;  %v1003_v22 = vld [vmem:[%s2643_s30 + $0x18] sm:$0xff]  ;;  %v1001_v25 = vld [vmem:[%s2643_s30 + $0x8] sm:$0xff] }
 0x217   : > { %v1255_v41 = vsel %vm1194_vm15, %v1241_v35, 0.0 }
 0x218   : > { %v1250_v34 = vadd.f32 %v1249_v33, %v1248_v30  ;;  %v1293_v30 = vld [vmem:[%s2656_s23 + $0x18] sm:$0xff]  ;;  %v1291_v33 = vld [vmem:[%s2656_s23 + $0x8] sm:$0xff] }
 0x21a   : > { %v1252_v38 = vadd.f32 %v1251_v37, %v1250_v34  ;;  %v1290_v34 = vld [vmem:[%s2656_s23] sm:$0xff]  ;;  %v2932_v37 = vld [vmem:[#allocation4 + $0x2] sm:$0x3] }
 0x21c   : > { %v1254_v42 = vadd.f32 %v1253_v39, %v1252_v38 }
 0x21e   : > { %v1256_v43 = vadd.f32 %v1255_v41, %v1254_v42 }
 0x220   : > { %v1257_v44 = vmax.f32 %v1256_v43, 1e-30 }
 0x222   : > { %2432 = vrcp.f32 %v1257_v44 }
 0x22f   : > { %v2433_v45 = vpop.eup %2432 }
 0x230   : > { %v1259_v60 = vmul.f32 %v2433_v45, %v1234_v0  ;;  %v1260_v47 = vmul.f32 %v2433_v45, %v1235_v4  ;;  %v1261_v48 = vmul.f32 %v2433_v45, %v1236_v7  ;;  %v1262_v49 = vmul.f32 %v2433_v45, %v1237_v10  ;;  %v1452_v10 = vld [vmem:[%s2661_s20 + $0x18] sm:$0xff] }
 0x231   : > { %v1263_v50 = vmul.f32 %v2433_v45, %v1238_v16  ;;  %v1264_v54 = vmul.f32 %v2433_v45, %v1239_v24  ;;  %v1265_v59 = vmul.f32 %v2433_v45, %v1240_v31  ;;  %v1002_v24 = vld [vmem:[%s2643_s30 + $0x10] sm:$0xff] }
 0x232   : > { %v1267_v51 = vmul.f32 %v1259_v60, %v2706_v3  ;;  %v1268_v52 = vmul.f32 %v1260_v47, %v2714_v14  ;;  %v1269_v53 = vmul.f32 %v1261_v48, %v2732_v28  ;;  %v1270_v55 = vmul.f32 %v1262_v49, %v2718_v17  ;;  %v1292_v31 = vld [vmem:[%s2656_s23 + $0x10] sm:$0xff]  ;;  %s3119_s23 = scalar_lea.vmem %s3070_s9, %s3141_s19 }
 0x233   : > { %v1271_v61 = vmul.f32 %v1263_v50, %v2738_v32  ;;  %v1266_v3 = vmul.f32 %v2433_v45, %v1241_v35  ;;  %v1272_v14 = vmul.f32 %v1264_v54, %v2722_v20  ;;  %v1273_v17 = vmul.f32 %v1265_v59, %v2742_v36  ;;  %v1451_v36 = vld [vmem:[%s2661_s20 + $0x10] sm:$0xff]  ;;  %v2929_v35 = vpop.f32.mrf.mxu1  ;;  %v2200_v42 = vld [vmem:[%s3119_s23] ss:$0 sm:$0xff] }
 0x234   : > { %v1275_v56 = vsel %vm1136_vm2, %v1267_v51, 0.0  ;;  %v1276_v57 = vsel %vm1136_vm2, %v1268_v52, 0.0  ;;  %v1278_v62 = vsel %vm1136_vm2, %v1269_v53, 0.0  ;;  %v1280_v28 = vsel %vm1136_vm2, %v1270_v55, 0.0  ;;  %v2199_v55 = vld [vmem:[%s3120_s26] ss:$0 sm:$0xff] }
 0x235   : > { %v1277_v58 = vadd.f32 %v1276_v57, %v1275_v56  ;;  %v1282_v2 = vsel %vm1136_vm2, %v1271_v61, 0.0  ;;  %v1284_v5 = vsel %vm1136_vm2, %v1272_v14, 0.0  ;;  %v1274_v32 = vmul.f32 %v1266_v3, %v2726_v23  ;;  %v1449_v23 = vld [vmem:[%s2661_s20] sm:$0xff]  ;;  %v2285_v38 = vpop.f32.mrf.mxu1 }
 0x236   : > { %v1286_v7 = vsel %vm1136_vm2, %v1273_v17, 0.0 }
 0x237   : > { %v1279_v63 = vadd.f32 %v1278_v62, %v1277_v58  ;;  %v1288_v20 = vsel %vm1136_vm2, %v1274_v32, 0.0 }
 0x239   : > { %v1281_v0 = vadd.f32 %v1280_v28, %v1279_v63 }
 0x23b   : > { %v1283_v4 = vadd.f32 %v1282_v2, %v1281_v0 }
 0x23d   : > { %v1285_v6 = vadd.f32 %v1284_v5, %v1283_v4 }
 0x23f   : > { %v1287_v9 = vadd.f32 %v1286_v7, %v1285_v6 }
 0x241   : > { %v1289_v8 = vadd.f32 %v1288_v20, %v1287_v9  ;;  %v1562_v9 = vsub.f32 1.0, %v2703_v1 }
 0x243   : > { %2306 = vmatmul.mubr.msk.f32.vlgmr.msra.gmra.mxu1 %vm844_vm5, %v1289_v8 }
 0x244   : > { %2320 = vmatpush3.msra.mxu1 %v1452_v10  ;;  %2327 = vmatprep.mubr.msk.f32.mxu1 %vm2502_vm6, %v2499_v26 }
 0x245   : > { %2321 = vmatprep.subr.mxu1 %v2499_v26 }
 0x246   : > { %2322 = vmatpush3.msra.mxu1 %v1451_v36 }
 0x247   : > { %2323 = vmatprep.subr.mxu1 %v2499_v26 }
 0x248   : > { %2324 = vmatpush3.msra.mxu1 %v1450_v11 }
 0x249   : > { %2325 = vmatprep.subr.mxu1 %v2499_v26 }
 0x24a   : > { %2326 = vmatpush3.msra.mxu1 %v1449_v23 }
 0x24b   : > { %2328 = vmatmul.mubr.msk.f32.vlgmr.msra.gmra.mxu1 %vm844_vm5, %v2884_v12  ;;  %2341 = vmatprep.subr.mxu1 %v2499_v26 }
 0x24c   : > { %2349 = vmatprep.mubr.msk.f32.mxu1 %vm2502_vm6, %v2499_v26 }
 0x269   : > { %v2892_v15 = vpop.permute.xlu0 %831  ;;  %v2894_v16 = vpop.permute.xlu1 %823 }
 0x26a   : > { %v834_v18 = vmul.f32 %v2892_v15, %v829_v13  ;;  %v826_v19 = vmul.f32 %v2894_v16, %v2884_v12  ;;  %v2976_v13 = vld [vmem:[#allocation5] sm:$0x3] }
 0x26c   : > { %v835_v21 = vadd.f32 %v834_v18, %v826_v19 }
 0x26e   : > { %2273 = vmatmul.mubr.msk.f32.vlgmr.msra.gmra.mxu0 %vm844_vm5, %v835_v21 }
 0x26f   : > { %2287 = vmatpush3.msra.mxu0 %v1003_v22  ;;  %2294 = vmatprep.mubr.msk.f32.mxu0 %vm2502_vm6, %v2499_v26 }
 0x270   : > { %2288 = vmatprep.subr.mxu0 %v2499_v26 }
 0x271   : > { %2289 = vmatpush3.msra.mxu0 %v1002_v24 }
 0x272   : > { %2290 = vmatprep.subr.mxu0 %v2499_v26 }
 0x273   : > { %2291 = vmatpush3.msra.mxu0 %v1001_v25  ;;  %v1707_v25 = vld [vmem:[%s3121_s28 + $0x18] sm:$0xff] }
 0x274   : > { %2292 = vmatprep.subr.mxu0 %v2499_v26  ;;  %2342 = vmatpush3.msra.mxu1 %v1707_v25 }
 0x275   : > { %2293 = vmatpush3.msra.mxu0 %v1000_v27  ;;  %2343 = vmatprep.subr.mxu1 %v2499_v26 }
 0x276   : > { %2295 = vmatmul.mubr.msk.f32.vlgmr.msra.gmra.mxu0 %vm844_vm5, %v2908_v29  ;;  %2308 = vmatprep.subr.mxu0 %v2499_v26 }
 0x277   : > { %2309 = vmatpush3.msra.mxu0 %v1293_v30  ;;  %2316 = vmatprep.mubr.msk.f32.mxu0 %vm2502_vm6, %v2499_v26 }
 0x278   : > { %2310 = vmatprep.subr.mxu0 %v2499_v26 }
 0x279   : > { %2311 = vmatpush3.msra.mxu0 %v1292_v31 }
 0x27a   : > { %2312 = vmatprep.subr.mxu0 %v2499_v26 }
 0x27b   : > { %2313 = vmatpush3.msra.mxu0 %v1291_v33 }
 0x27c   : > { %2314 = vmatprep.subr.mxu0 %v2499_v26 }
 0x27d   : > { %2315 = vmatpush3.msra.mxu0 %v1290_v34 }
 0x27e   : > { %2317 = vmatmul.mubr.msk.f32.vlgmr.msra.gmra.mxu0 %vm844_vm5, %v2761_v46  ;;  %2330 = vmatprep.subr.mxu0 %v2499_v26 }
 0x27f   : > { %2331 = vmatpush3.msra.mxu0 %v1452_v10  ;;  %2338 = vmatprep.mubr.msk.f32.mxu0 %vm2502_vm6, %v2499_v26  ;;  %v1792_v10 = vld [vmem:[%s2679_s21 + $0x18] sm:$0xff] }
 0x280   : > { %2332 = vmatprep.subr.mxu0 %v2499_v26 }
 0x281   : > { %2333 = vmatpush3.msra.mxu0 %v1451_v36  ;;  %v1791_v36 = vld [vmem:[%s2679_s21 + $0x10] sm:$0xff] }
 0x282   : > { %2334 = vmatprep.subr.mxu0 %v2499_v26 }
 0x283   : > { %2335 = vmatpush3.msra.mxu0 %v1450_v11  ;;  %v1790_v11 = vld [vmem:[%s2679_s21 + $0x8] sm:$0xff] }
 0x284   : > { %2336 = vmatprep.subr.mxu0 %v2499_v26 }
 0x285   : > { %2337 = vmatpush3.msra.mxu0 %v1449_v23  ;;  %v1789_v23 = vld [vmem:[%s2679_s21] sm:$0xff] }
 0x286   : > { %2339 = vmatmul.mubr.msk.f32.vlgmr.msra.gmra.mxu0 %vm844_vm5, %v2932_v37  ;;  %2352 = vmatprep.subr.mxu0 %v2499_v26 }
 0x287   : > { %2360 = vmatprep.mubr.msk.f32.mxu0 %vm2502_vm6, %v2499_v26  ;;  %2353 = vmatpush3.msra.mxu0 %v1792_v10 }
 0x288   : > { %2354 = vmatprep.subr.mxu0 %v2499_v26 }
 0x289   : > { %2355 = vmatpush3.msra.mxu0 %v1791_v36 }
 0x28a   : > { %2356 = vmatprep.subr.mxu0 %v2499_v26 }
 0x28b   : > { %2357 = vmatpush3.msra.mxu0 %v1790_v11 }
 0x28c   : > { %2358 = vmatprep.subr.mxu0 %v2499_v26 }
 0x28d   : > { %2359 = vmatpush3.msra.mxu0 %v1789_v23 }
 0x28e   : > { %2361 = vmatmul.mubr.msk.f32.vlgmr.msra.gmra.mxu0 %vm844_vm5, %v2976_v13 }
 0x303   : > { %v1367_v46 = vpop.f32.mrf.mxu1 }
 0x305   : > { %v2307_v39 = vpop.f32.mrf.mxu1 }
 0x306   : > { %v1705_v39 = vld [vmem:[%s3121_s28 + $0x8] sm:$0xff] }
 0x30b   : > { %v1529_v41 = vpop.f32.mrf.mxu1 }
 0x30c   : > { %v1530_v43 = vadd.f32 %v2200_v42, %v1529_v41 }
 0x30d   : > { %v2329_v44 = vpop.f32.mrf.mxu1 }
 0x30e   : > { %1541 = vrot.lane.b32.xlu1 %v1530_v43, %s2503_s27 }
 0x32e   : > { %v2946_v45 = vpop.f32.mrf.mxu0 }
 0x330   : > { %v2274_v60 = vpop.f32.mrf.mxu0 }
 0x336   : > { %v2948_v47 = vpop.f32.mrf.mxu0 }
 0x338   : > { %v2296_v48 = vpop.f32.mrf.mxu0 }
 0x33e   : > { %v1437_v49 = vpop.f32.mrf.mxu0 }
 0x33f   : > { %v1438_v54 = vadd.f32 %v1437_v49, %v1367_v46  ;;  %v1706_v46 = vld [vmem:[%s3121_s28 + $0x10] sm:$0xff]  ;;  %v988_v49 = vadd.f32 %v2929_v35, %v2946_v45 }
 0x340   : > { %v2318_v50 = vpop.f32.mrf.mxu0  ;;  %2344 = vmatpush3.msra.mxu1 %v1706_v46 }
 0x341   : > { %v1448_v56 = vadd.f32 %v2199_v55, %v1438_v54  ;;  %2345 = vmatprep.subr.mxu1 %v2499_v26  ;;  %v2184_v50 = vld [vmem:[%s3125_s24] ss:$0 sm:$0xff] }
 0x342   : > { %2346 = vmatpush3.msra.mxu1 %v1705_v39 }
 0x343   : > { %v1533_v57 = vadd.f32 %v1530_v43, %v1448_v56  ;;  %v1704_v43 = vld [vmem:[%s3121_s28] sm:$0xff]  ;;  %2347 = vmatprep.subr.mxu1 %v2499_v26 }
 0x344   : > { %2348 = vmatpush3.msra.mxu1 %v1704_v43 }
 0x345   : > { %v2202_v58 = vmul.f32 -1.442695, %v1533_v57 }
 0x346   : > { %v1653_v51 = vpop.f32.mrf.mxu0 }
 0x347   : > { %v1654_v52 = vadd.f32 %v2200_v42, %v1653_v51  ;;  %2434 = vpow2.f32 %v2202_v58  ;;  %v998_v51 = vadd.f32 %v2184_v50, %v988_v49 }
 0x348   : > { %v2340_v53 = vpop.f32.mrf.mxu0 }
 0x349   : > { %1665 = vrot.lane.b32.xlu1 %v1654_v52, %s2503_s27  ;;  %v1657_v14 = vadd.f32 %v1654_v52, %v1448_v56 }
 0x34b   : > { %v2204_v28 = vmul.f32 -1.442695, %v1657_v14 }
 0x354   : > { %v2435_v59 = vpop.eup %2434 }
 0x355   : > { %v1537_v61 = vadd.f32 1.0, %v2435_v59 }
 0x357   : > { %2436 = vrcp.f32 %v1537_v61 }
 0x358   : > { %2438 = vpow2.f32 %v2204_v28 }
 0x364   : > { %v2437_v62 = vpop.eup %2436 }
 0x365   : > { %v2439_v0 = vpop.eup %2438  ;;  %v1551_v22 = vsub.f32 1.0, %v2437_v62 }
 0x366   : > { %v1661_v17 = vadd.f32 1.0, %v2439_v0 }
 0x368   : > { %2440 = vrcp.f32 %v1661_v17 }
 0x375   : > { %v2957_v2 = vpop.eup %2440 }
 0x376   : > { %v1675_v42 = vsub.f32 1.0, %v2957_v2 }
 0x380   : > { %v1542_v63 = vpop.permute.xlu1 %1541 }
 0x381   : > { %v1544_v3 = vmul.f32 %v2437_v62, %v1542_v63  ;;  %v1869_v63 = vpop.f32.mrf.mxu0 }
 0x383   : > { %1546 = vrot.lane.b32.xlu1 %v1544_v3, %s2503_s27  ;;  %v2362_v14 = vpop.f32.mrf.mxu0 }
 0x3bb   : > { %v1666_v4 = vpop.permute.xlu1 %1665 }
 0x3bc   : > { %v1668_v5 = vmul.f32 %v2957_v2, %v1666_v4 }
 0x3be   : > { %1670 = vrot.lane.b32.xlu1 %v1668_v5, %s2503_s27 }
 0x3c2   : > { %1571 = vperm.xlu1 %2411, %v2703_v1  }
 0x3c6   : > { %2413 = vset.pattern.permute.xlu1 %v2500_v40 }
 0x3c7   : > { %1692 = vperm.xlu1 %2413, %v2703_v1  }
 0x3cb   : > { %1557 = vrot.lane.b32.xlu1 %v2884_v12, %s2504_s29 }
 0x3f5   : > { %v1547_v32 = vpop.permute.xlu1 %1546 }
 0x3f6   : > { %v1549_v6 = vadd.f32 %v1547_v32, %v1448_v56 }
 0x3f8   : > { %2442 = vtanh.f32 %v1549_v6 }
 0x405   : > { %v2443_v7 = vpop.eup %2442 }
 0x406   : > { %1553 = vrot.lane.b32.xlu1 %v2443_v7, %s2505_s2 }
 0x40a   : > { %1681 = vrot.lane.b32.xlu1 %v2932_v37, %s2504_s29 }
 0x40e   : > { %1687 = vperm.xlu1 %2413, %v1562_v9  }
 0x430   : > { %v1671_v20 = vpop.permute.xlu1 %1670 }
 0x431   : > { %v1673_v8 = vadd.f32 %v1671_v20, %v1448_v56 }
 0x433   : > { %2444 = vtanh.f32 %v1673_v8 }
 0x43d   : > { %v1572_v1 = vpop.permute.xlu1 %1571 }
 0x440   : > { %v2445_v18 = vpop.eup %2444 }
 0x441   : > { %1677 = vrot.lane.b32.xlu0 %v2445_v18, %s2505_s2 }
 0x442   : > { %v1693_v19 = vpop.permute.xlu1 %1692 }
 0x445   : > { %1565 = vperm.xlu0 %2414, %v1562_v9  }
 0x446   : > { %v1558_v21 = vpop.permute.xlu1 %1557 }
 0x447   : > { %v1560_v27 = vmul.f32 %v2437_v62, %v1558_v21  ;;  %v2207_v62 = vld [vmem:[%s763_s7] ss:$0 sm:$0xff] }
 0x448   : > { %v1870_v3 = vadd.f32 %v2207_v62, %v1869_v63 }
 0x449   : > { %2415 = vset.pattern.permute.xlu0 %v2500_v40  ;;  %v2185_v40 = vld [vmem:[%s3123_s3] ss:$0 sm:$0xff] }
 0x44a   : > { %v1081_v34 = vadd.f32 %v2185_v40, %v2948_v47 }
 0x44c   : > { %v1084_v52 = vadd.f32 %v1081_v34, %v998_v51 }
 0x44e   : > { %v2187_v53 = vmul.f32 -1.442695, %v1084_v52 }
 0x450   : > { %2446 = vpow2.f32 %v2187_v53 }
 0x45d   : > { %v2447_v54 = vpop.eup %2446 }
 0x45e   : > { %v1088_v26 = vadd.f32 1.0, %v2447_v54 }
 0x460   : > { %2448 = vrcp.f32 %v1088_v26 }
 0x46d   : > { %v2449_v35 = vpop.eup %2448 }
 0x478   : > { %v1554_v24 = vpop.permute.xlu1 %1553 }
 0x479   : > { %v1556_v30 = vmul.f32 %v1554_v24, %v1551_v22  ;;  %v1102_v22 = vsub.f32 1.0, %v2449_v35 }
 0x47b   : > { %v1561_v31 = vadd.f32 %v1560_v27, %v1556_v30 }
 0x47c   : > { %v1682_v38 = vpop.permute.xlu1 %1681 }
 0x47d   : > { %v1574_v33 = vmul.f32 %v1572_v1, %v1561_v31  ;;  %v1684_v44 = vmul.f32 %v2957_v2, %v1682_v38 }
 0x47f   : > { %1576 = vrot.lane.b32.xlu1 %v1574_v33, %s2505_s2 }
 0x483   : > { %1092 = vrot.lane.b32.xlu1 %v1081_v34, %s2503_s27 }
 0x489   : > { %v1688_v56 = vpop.permute.xlu1 %1687 }
 0x4b3   : > { %v1678_v41 = vpop.permute.xlu0 %1677 }
 0x4b4   : > { %v1680_v60 = vmul.f32 %v1678_v41, %v1675_v42 }
 0x4b6   : > { %v1685_v47 = vadd.f32 %v1684_v44, %v1680_v60 }
 0x4b8   : > { %v1695_v48 = vmul.f32 %v1693_v19, %v1685_v47 }
 0x4ba   : > { %1697 = vrot.lane.b32.xlu0 %v1695_v48, %s2505_s2 }
 0x4be   : > { %1881 = vrot.lane.b32.xlu0 %v1870_v3, %s2503_s27 }
 0x4c0   : > { %v1566_v55 = vpop.permute.xlu0 %1565 }
 0x4c1   : > { %v1568_v57 = vmul.f32 %v1566_v55, %v2884_v12  ;;  %v1690_v12 = vmul.f32 %v1688_v56, %v2932_v37  ;;  %v2205_v37 = vld [vmem:[%s760_s6] ss:$0 sm:$0xff]  ;;  %s2210_s6 = sshll.u32 %s3118_s12, 1 }
 0x4c2   : > { %s1907_s19 = scalar_lea.vmem [#allocation2], %s2210_s6 }
 0x4f1   : > { %v1577_v58 = vpop.permute.xlu1 %1576 }
 0x4f2   : > { %v1579_v59 = vadd.f32 %v1577_v58, %v1568_v57 }
 0x4f4   : > { %1580 = vst.msk [vmem:[#allocation4] sm:$0x3] %vm1136_vm2, %v1579_v59  ;;  %v1581_v17 = vmul.f32 %v1579_v59, %v2894_v16 }
 0x4f5   : > { %v1093_v45 = vpop.permute.xlu1 %1092 }
 0x4f6   : > { %v1095_v61 = vmul.f32 %v2449_v35, %v1093_v45 }
 0x4f8   : > { %1097 = vrot.lane.b32.xlu1 %v1095_v61, %s2503_s27 }
 0x52c   : > { %v1698_v28 = vpop.permute.xlu0 %1697 }
 0x52d   : > { %v1700_v0 = vadd.f32 %v1698_v28, %v1690_v12 }
 0x52f   : > { %1701 = vst.msk [vmem:[#allocation4 + $0x2] sm:$0x3] %vm1136_vm2, %v1700_v0  ;;  %v1702_v2 = vmul.f32 %v1700_v0, %v2892_v15 }
 0x530   : > { %v1882_v36 = vpop.permute.xlu0 %1881 }
 0x531   : > { %v1703_v4 = vadd.f32 %v1702_v2, %v1581_v17 }
 0x533   : > { %2350 = vmatmul.mubr.msk.f32.vlgmr.msra.gmra.mxu1 %vm844_vm5, %v1703_v4 }
 0x56a   : > { %v1098_v5 = vpop.permute.xlu1 %1097 }
 0x56b   : > { %v1100_v32 = vadd.f32 %v1098_v5, %v998_v51 }
 0x56d   : > { %2450 = vtanh.f32 %v1100_v32 }
 0x57a   : > { %v2451_v6 = vpop.eup %2450 }
 0x57b   : > { %1104 = vrot.lane.b32.xlu1 %v2451_v6, %s2505_s2 }
 0x5ed   : > { %v1105_v21 = vpop.permute.xlu1 %1104 }
 0x5ee   : > { %v1107_v27 = vmul.f32 %v1105_v21, %v1102_v22 }
 0x5f3   : > { %v1784_v7 = vpop.f32.mrf.mxu1 }
 0x5f4   : > { %v1785_v16 = vadd.f32 %v2205_v37, %v1784_v7 }
 0x5f5   : > { %v2351_v9 = vpop.f32.mrf.mxu1 }
 0x5f6   : > { %v1873_v20 = vadd.f32 %v1870_v3, %v1785_v16 }
 0x5f8   : > { %v2209_v8 = vmul.f32 -1.442695, %v1873_v20 }
 0x5fa   : > { %2452 = vpow2.f32 %v2209_v8 }
 0x607   : > { %v2453_v15 = vpop.eup %2452 }
 0x608   : > { %v1877_v10 = vadd.f32 1.0, %v2453_v15 }
 0x60a   : > { %2454 = vrcp.f32 %v1877_v10 }
 0x617   : > { %v2455_v11 = vpop.eup %2454 }
 0x618   : > { %v1884_v23 = vmul.f32 %v2455_v11, %v1882_v36  ;;  %v1891_v31 = vsub.f32 1.0, %v2455_v11 }
 0x61a   : > { %1886 = vrot.lane.b32.xlu0 %v1884_v23, %s2503_s27 }
 0x61e   : > { %1108 = vrot.lane.b32.xlu0 %v2908_v29, %s2504_s29 }
 0x622   : > { %1897 = vrot.lane.b32.xlu0 %v2976_v13, %s2504_s29 }
 0x68c   : > { %v1887_v18 = vpop.permute.xlu0 %1886 }
 0x68d   : > { %v1889_v1 = vadd.f32 %v1887_v18, %v1785_v16 }
 0x68f   : > { %2456 = vtanh.f32 %v1889_v1 }
 0x690   : > { %v1109_v19 = vpop.permute.xlu0 %1108 }
 0x691   : > { %v1111_v24 = vmul.f32 %v2449_v35, %v1109_v19 }
 0x693   : > { %v1112_v30 = vadd.f32 %v1111_v24, %v1107_v27 }
 0x694   : > { %v1898_v29 = vpop.permute.xlu0 %1897 }
 0x695   : > { %v1900_v13 = vmul.f32 %v2455_v11, %v1898_v29 }
 0x69c   : > { %v2457_v25 = vpop.eup %2456 }
 0x69d   : > { %1893 = vrot.lane.b32.xlu1 %v2457_v25, %s2505_s2 }
 0x6a1   : > { %1903 = vrot.lane.b32.xlu1 %v1112_v30, %s2505_s2 }
 0x70f   : > { %v1894_v33 = vpop.permute.xlu1 %1893 }
 0x710   : > { %v1896_v40 = vmul.f32 %v1894_v33, %v1891_v31 }
 0x712   : > { %v1901_v34 = vadd.f32 %v1900_v13, %v1896_v40 }
 0x713   : > { %v1904_v38 = vpop.permute.xlu1 %1903 }
 0x714   : > { %1908 = vst.msk [vmem:[%s1907_s19] sm:$0x3] %vm1136_vm2, %v1904_v38  ;;  %1909 = vst.msk [vmem:[#allocation3] sm:$0x3] %vm1136_vm2, %v1904_v38  ;;  %1911 = vrot.lane.b32.xlu0 %v1901_v34, %s2505_s2 }
 0x786   : > { %v1912_v46 = vpop.permute.xlu0 %1911 }
 0x787   : > { %1914 = vst.msk [vmem:[#allocation5] sm:$0x3] %vm1136_vm2, %v1912_v46  ;;  %1915 = vst.msk [vmem:[%s774_s5] sm:$0x3] %vm1136_vm2, %v1912_v46 }
 0x788 PF: > { %s3129_s12 = sld [smem:[#allocation9_spill]] }
 0x789   : > { %s3130_s18 = sld [smem:[#allocation7_spill]] }
 0x78a   : > { %s3131_s19 = sld [smem:[#allocation8_spill]] }
 0x78b   : > { %s3132_s20 = sld [smem:[#allocation10_spill]] }
 0x78c   : > { %s3133_s21 = sld [smem:[#allocation11_spill]] }
 0x78e   : > { %s25_s22 = sadd.s32 1, %s3129_s12  }
 0x78f   : > { %p22_p8 = scmp.ge.s32.totalorder %s25_s22, 18  }
 0x791   :  { %24 = sbr.rel (!%p22_p8) target bundleno = 12 (0xc), region = 158 }

</bundles_post_ra>
